<compile_context>
chip_gen: v7x
topology: tpu7x:2x2x1
jax: 0.10.0
libtpu: 0.0.40
codegen_flags: <defaults>
</compile_context>

<pallas_src>
import numpy as np

import jax
import jax.numpy as jnp
from jax import lax
from jax.experimental import pallas as pl
from jax.experimental.pallas import tpu as pltpu


# -----------------------------------------------------------------------------
# Kernel
# -----------------------------------------------------------------------------
def _fused_block_kernel(x_ref, w1_ref, w2_ref, b1_ref, b2_ref, o_ref,
                        xpad, mid, lhs):
    """Fused conv3x3+BN+ReLU -> conv3x3+BN+residual+ReLU for Nb stacked samples.

    Layout: activations are (rows, W*C) with channels minor (lane-dense).
    A 3x3 conv = one (M, 3*WC) x (3*WC, WC) matmul against a block-Toeplitz
    weight matrix (W-direction zero padding + BN scale folded into the weights;
    H-direction padding = zero rows in the stacked VMEM slab).

    x_ref : (Nb, H, WC)   f32   input block (also the residual source)
    w1_ref: (3*WC, WC)    bf16  conv1 Toeplitz weights (BN1 scale folded in)
    w2_ref: (3*WC, WC)    bf16  conv2 Toeplitz weights (BN2 scale folded in)
    b1_ref, b2_ref: (1, WC) f32 folded BN biases (tiled per w position)
    o_ref : (Nb, H, WC)   f32
    xpad  : (Nb*(H+2)+2, WC) f32  VMEM scratch, stacked H-padded input
    mid   : (Nb*(H+2)+2, WC) f32  VMEM scratch, stacked H-padded stage-1 output
    lhs   : (Nb*(H+2), 3*WC) bf16 VMEM scratch, K-staged matmul LHS (reused)
    """
    Nb, H, WC = x_ref.shape
    Hp = H + 2                 # per-sample row stride in the padded slab
    M = Nb * Hp                # matmul M (includes discarded separator rows)

    zero_row = jnp.zeros((1, WC), jnp.float32)

    # ---- build the stacked, H-padded input slab ------------------------------
    # sample i lives at rows [i*Hp+1, i*Hp+H]; rows i*Hp and i*Hp+H+1 are zero
    # (they double as the separator between consecutive samples).
    for i in range(Nb):
        base = i * Hp
        xpad[base:base + 1, :] = zero_row
        xpad[base + 1:base + H + 1, :] = x_ref[i]
        xpad[base + H + 1:base + H + 2, :] = zero_row
    xpad[M:M + 2, :] = jnp.zeros((2, WC), jnp.float32)    # trailing halo rows

    def conv3x3(src_ref, w_ref):
        # Stage the three kh-shifted row windows side by side along K so the
        # whole conv is ONE MXU matmul with in-MXU K accumulation.
        for kh in range(3):
            lhs[:, kh * WC:(kh + 1) * WC] = (
                src_ref[kh:kh + M, :].astype(jnp.bfloat16))
        return jnp.dot(lhs[...], w_ref[...], preferred_element_type=jnp.float32)

    # ---- stage 1: conv1 (*BN1 scale in weights) + bias + ReLU (stays in VMEM)
    out1 = jnp.maximum(conv3x3(xpad, w1_ref) + b1_ref[...], 0.0)

    # Re-pad stage-1 output into the same stacked layout (separator rows zero;
    # the junk rows of `out1` at i*Hp+H / i*Hp+H+1 are simply never copied).
    for i in range(Nb):
        base = i * Hp
        mid[base:base + 1, :] = zero_row
        mid[base + 1:base + H + 1, :] = out1[base:base + H, :]
        mid[base + H + 1:base + H + 2, :] = zero_row
    mid[M:M + 2, :] = jnp.zeros((2, WC), jnp.float32)

    # ---- stage 2: conv2 (*BN2 scale in weights) + bias + residual + ReLU -----
    out2 = conv3x3(mid, w2_ref) + b2_ref[...]
    for i in range(Nb):
        base = i * Hp
        o_ref[i] = jnp.maximum(out2[base:base + H, :] + x_ref[i],
                               0.0).astype(o_ref.dtype)


# -----------------------------------------------------------------------------
# Wrapper-side weight / BN preparation
# -----------------------------------------------------------------------------
def _bn_scale_bias(gamma, beta, mean, var, eps=1e-5):
    scale = gamma / jnp.sqrt(var + eps)
    bias = beta - mean * scale
    return scale, bias


def _toeplitz_conv_weights(w_oihw, W, bn_scale):
    """(Cout, Cin, 3, 3) -> (3*W*Cin, W*Cout) block-Toeplitz matrix, bf16.

    big[kh, wi*Cin + ci, w*Cout + co] = w[co, ci, kh, wi - w + 1]
    (zero when wi - w + 1 is outside {0,1,2}); this folds the W-direction zero
    padding of the SAME-padded 3x3 conv into the weight matrix. The BN scale
    (per output channel) is folded into the output columns in f32 BEFORE the
    bf16 cast.
    """
    Cout, Cin = w_oihw.shape[0], w_oihw.shape[1]
    wt = jnp.transpose(w_oihw, (2, 3, 1, 0))              # (kh, kw, Cin, Cout)
    big = jnp.zeros((3, W, W, Cin, Cout), jnp.float32)    # [kh, wi, w, ci, co]
    for kw in range(3):
        w_idx = np.arange(W)
        wi_idx = w_idx + kw - 1
        m = (wi_idx >= 0) & (wi_idx < W)
        big = big.at[:, wi_idx[m], w_idx[m]].set(wt[:, kw][:, None])
    big = jnp.transpose(big, (0, 1, 3, 2, 4))             # [kh, wi, ci, w, co]
    big = big.reshape(3, W * Cin, W * Cout)
    big = big * jnp.tile(bn_scale, W)[None, None, :]      # fold BN scale (f32)
    return big.reshape(3 * W * Cin, W * Cout).astype(jnp.bfloat16)


def _pick_nb(N, H, target_m=256):
    """Samples per grid step: aim for M=Nb*(H+2)~256 but keep >=2 grid steps."""
    Hp = H + 2
    cap = max(1, target_m // Hp)
    if N >= 2:
        cap = min(cap, N // 2)   # >= 2 parallel steps -> both v7x TCs get work
    cap = max(1, min(cap, N))
    for nb in range(cap, 0, -1):
        if N % nb == 0:
            return nb
    return 1


# -----------------------------------------------------------------------------
# Entry points
# -----------------------------------------------------------------------------
@jax.jit
def trans_basic_block_nhwc(x_nhwc, params):
    """TransBasicBlock forward, channels-minor layout. x: (N, H, W, C) f32."""
    N, H, W, C = x_nhwc.shape
    WC = W * C
    assert WC % 128 == 0, "lane-dense layout needs W*C to be a multiple of 128"
    # TODO(synk): tile W / output-channel axis (or switch to im2col K=9*C) for
    # large W*C where the (W*C)^2 Toeplitz weights no longer fit VMEM.

    x = x_nhwc.reshape(N, H, WC)

    s1, b1 = _bn_scale_bias(params["bn1_gamma"], params["bn1_beta"],
                            params["bn1_mean"], params["bn1_var"])
    s2, b2 = _bn_scale_bias(params["bn2_gamma"], params["bn2_beta"],
                            params["bn2_mean"], params["bn2_var"])
    w1 = _toeplitz_conv_weights(params["conv1_w"], W, s1)
    w2 = _toeplitz_conv_weights(params["conv2_w"], W, s2)
    b1t = jnp.tile(b1, W).reshape(1, WC)
    b2t = jnp.tile(b2, W).reshape(1, WC)

    Nb = _pick_nb(N, H)
    Hp = H + 2
    M = Nb * Hp

    out = pl.pallas_call(
        _fused_block_kernel,
        out_shape=jax.ShapeDtypeStruct((N, H, WC), jnp.float32),
        grid_spec=pltpu.PrefetchScalarGridSpec(
            num_scalar_prefetch=0,
            grid=(N // Nb,),
            in_specs=[
                pl.BlockSpec((Nb, H, WC), lambda n: (n, 0, 0)),      # x / residual
                pl.BlockSpec((3 * WC, WC), lambda n: (0, 0)),        # conv1 W
                pl.BlockSpec((3 * WC, WC), lambda n: (0, 0)),        # conv2 W
                pl.BlockSpec((1, WC), lambda n: (0, 0)),             # bn1 bias
                pl.BlockSpec((1, WC), lambda n: (0, 0)),             # bn2 bias
            ],
            out_specs=pl.BlockSpec((Nb, H, WC), lambda n: (n, 0, 0)),
            scratch_shapes=[
                pltpu.VMEM((M + 2, WC), jnp.float32),    # stacked padded input
                pltpu.VMEM((M + 2, WC), jnp.float32),    # stacked padded stage-1
                pltpu.VMEM((M, 3 * WC), jnp.bfloat16),   # K-staged matmul LHS
            ],
        ),
        compiler_params=pltpu.CompilerParams(
            dimension_semantics=("parallel",),
            vmem_limit_bytes=32 * 1024 * 1024),
    )(x, w1, w2, b1t, b2t)

    return out.reshape(N, H, W, C)


def trans_basic_block(x_nchw, params):
    """NCHW wrapper for exact PyTorch-module interface parity.

    NOTE: the two transposes are whole-activation HBM round trips; prefer
    calling trans_basic_block_nhwc directly with channels-minor data.
    """
    x = jnp.transpose(x_nchw, (0, 2, 3, 1))
    return jnp.transpose(trans_basic_block_nhwc(x, params), (0, 3, 1, 2))


# -----------------------------------------------------------------------------
# Pure-JAX (XLA) reference + test harness
# -----------------------------------------------------------------------------
def _reference_nhwc(x_nhwc, params, eps=1e-5):
    def conv(inp, w_oihw):
        w_hwio = jnp.transpose(w_oihw, (2, 3, 1, 0))
        return lax.conv_general_dilated(
            inp, w_hwio, window_strides=(1, 1), padding="SAME",
            dimension_numbers=("NHWC", "HWIO", "NHWC"))

    def bn(inp, g, b, m, v):
        return (inp - m) / jnp.sqrt(v + eps) * g + b

    out = conv(x_nhwc, params["conv1_w"])
    out = bn(out, params["bn1_gamma"], params["bn1_beta"],
             params["bn1_mean"], params["bn1_var"])
    out = jnp.maximum(out, 0.0)
    out = conv(out, params["conv2_w"])
    out = bn(out, params["bn2_gamma"], params["bn2_beta"],
             params["bn2_mean"], params["bn2_var"])
    return jnp.maximum(out + x_nhwc, 0.0)


def make_params(key, inplanes, planes):
    ks = jax.random.split(key, 10)
    return {
        "conv1_w": 0.1 * jax.random.normal(ks[0], (inplanes, inplanes, 3, 3), jnp.float32),
        "conv2_w": 0.1 * jax.random.normal(ks[1], (planes, inplanes, 3, 3), jnp.float32),
        "bn1_gamma": jax.random.uniform(ks[2], (inplanes,), jnp.float32, 0.5, 1.5),
        "bn1_beta": 0.1 * jax.random.normal(ks[3], (inplanes,), jnp.float32),
        "bn1_mean": 0.1 * jax.random.normal(ks[4], (inplanes,), jnp.float32),
        "bn1_var": jax.random.uniform(ks[5], (inplanes,), jnp.float32, 0.5, 1.5),
        "bn2_gamma": jax.random.uniform(ks[6], (planes,), jnp.float32, 0.5, 1.5),
        "bn2_beta": 0.1 * jax.random.normal(ks[7], (planes,), jnp.float32),
        "bn2_mean": 0.1 * jax.random.normal(ks[8], (planes,), jnp.float32),
        "bn2_var": jax.random.uniform(ks[9], (planes,), jnp.float32, 0.5, 1.5),
    }


if __name__ == "__main__":
    key = jax.random.PRNGKey(0)
    kx, kp = jax.random.split(key)

    # inplanes == planes (stride=1, upsample=None); W*C = 128 -> lane-dense.
    # N=8 so the batched grid is (2,) with Nb=4 samples (M = 4*18 = 72) per step.
    N, C, H, W = 8, 8, 16, 16
    x_nhwc = jax.random.normal(kx, (N, H, W, C), jnp.float32)
    params = make_params(kp, C, C)

    # Primary (transpose-free, channels-minor) path.
    out = trans_basic_block_nhwc(x_nhwc, params)
    out = jax.block_until_ready(out)

    ref = _reference_nhwc(x_nhwc, params)
    assert out.shape == ref.shape == (N, H, W, C)
    # bf16 matmul operands with f32 accumulation -> looser tolerance than pure f32
    assert jnp.allclose(out, ref, atol=5e-2, rtol=5e-2), (
        float(jnp.max(jnp.abs(out - ref))))

    # NCHW module-interface wrapper (adds two layout transposes around the kernel).
    x_nchw = jnp.transpose(x_nhwc, (0, 3, 1, 2))
    out_nchw = jax.block_until_ready(trans_basic_block(x_nchw, params))
    ref_nchw = jnp.transpose(ref, (0, 3, 1, 2))
    assert jnp.allclose(out_nchw, ref_nchw, atol=5e-2, rtol=5e-2), (
        float(jnp.max(jnp.abs(out_nchw - ref_nchw))))

    print("KERNEL_OK")
</pallas_src>

<mosaic_0001>
module attributes {stable_mosaic.version = 11 : i64} {
  func.func @_fused_block_kernel(%arg0: i32, %arg1: memref<4x16x128xf32, #tpu.memory_space<vmem>>, %arg2: memref<384x128xbf16, #tpu.memory_space<vmem>>, %arg3: memref<384x128xbf16, #tpu.memory_space<vmem>>, %arg4: memref<1x128xf32, #tpu.memory_space<vmem>>, %arg5: memref<1x128xf32, #tpu.memory_space<vmem>>, %arg6: memref<4x16x128xf32, #tpu.memory_space<vmem>>, %arg7: memref<74x128xf32, #tpu.memory_space<vmem>>, %arg8: memref<74x128xf32, #tpu.memory_space<vmem>>, %arg9: memref<72x384xbf16, #tpu.memory_space<vmem>>) attributes {dimension_semantics = [#tpu.dimension_semantics<parallel>], iteration_bounds = array<i64: 2>, scalar_prefetch = 0 : i64, scratch_operands = 3 : i64, tpu.core_type = #tpu.core_type<tc>, window_params = [{transform_indices = @transform_0, window_bounds = array<i64: 4, 16, 128>}, {pipeline_mode = #tpu.pipeline_mode<synchronous>, transform_indices = @transform_1, window_bounds = array<i64: 384, 128>}, {pipeline_mode = #tpu.pipeline_mode<synchronous>, transform_indices = @transform_2, window_bounds = array<i64: 384, 128>}, {pipeline_mode = #tpu.pipeline_mode<synchronous>, transform_indices = @transform_3, window_bounds = array<i64: 1, 128>}, {pipeline_mode = #tpu.pipeline_mode<synchronous>, transform_indices = @transform_4, window_bounds = array<i64: 1, 128>}, {transform_indices = @transform_5, window_bounds = array<i64: 4, 16, 128>}]} {
    %cst = arith.constant 0.000000e+00 : f32
    %0 = vector.broadcast %cst : f32 to vector<1x128xf32>
    %c0 = arith.constant 0 : index
    %c0_0 = arith.constant 0 : index
    %1 = vector.load %arg7[%c0, %c0_0] : memref<74x128xf32, #tpu.memory_space<vmem>>, vector<1x128xf32>
    tpu.vector_store %arg7[%c0, %c0_0], %0 {strides = array<i32>} : memref<74x128xf32, #tpu.memory_space<vmem>>, vector<1x128xf32>,
    %c0_1 = arith.constant 0 : index
    %c0_2 = arith.constant 0 : index
    %c0_3 = arith.constant 0 : index
    %2 = vector.load %arg1[%c0_1, %c0_2, %c0_3] : memref<4x16x128xf32, #tpu.memory_space<vmem>>, vector<1x16x128xf32>
    %3 = vector.shape_cast %2 : vector<1x16x128xf32> to vector<16x128xf32>
    %c1 = arith.constant 1 : index
    %c0_4 = arith.constant 0 : index
    %4 = vector.load %arg7[%c1, %c0_4] : memref<74x128xf32, #tpu.memory_space<vmem>>, vector<16x128xf32>
    tpu.vector_store %arg7[%c1, %c0_4], %3 {strides = array<i32>} : memref<74x128xf32, #tpu.memory_space<vmem>>, vector<16x128xf32>,
    %c17 = arith.constant 17 : index
    %c0_5 = arith.constant 0 : index
    %5 = vector.load %arg7[%c17, %c0_5] : memref<74x128xf32, #tpu.memory_space<vmem>>, vector<1x128xf32>
    tpu.vector_store %arg7[%c17, %c0_5], %0 {strides = array<i32>} : memref<74x128xf32, #tpu.memory_space<vmem>>, vector<1x128xf32>,
    %c18 = arith.constant 18 : index
    %c0_6 = arith.constant 0 : index
    %6 = vector.load %arg7[%c18, %c0_6] : memref<74x128xf32, #tpu.memory_space<vmem>>, vector<1x128xf32>
    tpu.vector_store %arg7[%c18, %c0_6], %0 {strides = array<i32>} : memref<74x128xf32, #tpu.memory_space<vmem>>, vector<1x128xf32>,
    %c1_7 = arith.constant 1 : index
    %c0_8 = arith.constant 0 : index
    %c0_9 = arith.constant 0 : index
    %7 = vector.load %arg1[%c1_7, %c0_8, %c0_9] : memref<4x16x128xf32, #tpu.memory_space<vmem>>, vector<1x16x128xf32>
    %8 = vector.shape_cast %7 : vector<1x16x128xf32> to vector<16x128xf32>
    %c19 = arith.constant 19 : index
    %c0_10 = arith.constant 0 : index
    %9 = vector.load %arg7[%c19, %c0_10] : memref<74x128xf32, #tpu.memory_space<vmem>>, vector<16x128xf32>
    tpu.vector_store %arg7[%c19, %c0_10], %8 {strides = array<i32>} : memref<74x128xf32, #tpu.memory_space<vmem>>, vector<16x128xf32>,
    %c35 = arith.constant 35 : index
    %c0_11 = arith.constant 0 : index
    %10 = vector.load %arg7[%c35, %c0_11] : memref<74x128xf32, #tpu.memory_space<vmem>>, vector<1x128xf32>
    tpu.vector_store %arg7[%c35, %c0_11], %0 {strides = array<i32>} : memref<74x128xf32, #tpu.memory_space<vmem>>, vector<1x128xf32>,
    %c36 = arith.constant 36 : index
    %c0_12 = arith.constant 0 : index
    %11 = vector.load %arg7[%c36, %c0_12] : memref<74x128xf32, #tpu.memory_space<vmem>>, vector<1x128xf32>
    tpu.vector_store %arg7[%c36, %c0_12], %0 {strides = array<i32>} : memref<74x128xf32, #tpu.memory_space<vmem>>, vector<1x128xf32>,
    %c2 = arith.constant 2 : index
    %c0_13 = arith.constant 0 : index
    %c0_14 = arith.constant 0 : index
    %12 = vector.load %arg1[%c2, %c0_13, %c0_14] : memref<4x16x128xf32, #tpu.memory_space<vmem>>, vector<1x16x128xf32>
    %13 = vector.shape_cast %12 : vector<1x16x128xf32> to vector<16x128xf32>
    %c37 = arith.constant 37 : index
    %c0_15 = arith.constant 0 : index
    %14 = vector.load %arg7[%c37, %c0_15] : memref<74x128xf32, #tpu.memory_space<vmem>>, vector<16x128xf32>
    tpu.vector_store %arg7[%c37, %c0_15], %13 {strides = array<i32>} : memref<74x128xf32, #tpu.memory_space<vmem>>, vector<16x128xf32>,
    %c53 = arith.constant 53 : index
    %c0_16 = arith.constant 0 : index
    %15 = vector.load %arg7[%c53, %c0_16] : memref<74x128xf32, #tpu.memory_space<vmem>>, vector<1x128xf32>
    tpu.vector_store %arg7[%c53, %c0_16], %0 {strides = array<i32>} : memref<74x128xf32, #tpu.memory_space<vmem>>, vector<1x128xf32>,
    %c54 = arith.constant 54 : index
    %c0_17 = arith.constant 0 : index
    %16 = vector.load %arg7[%c54, %c0_17] : memref<74x128xf32, #tpu.memory_space<vmem>>, vector<1x128xf32>
    tpu.vector_store %arg7[%c54, %c0_17], %0 {strides = array<i32>} : memref<74x128xf32, #tpu.memory_space<vmem>>, vector<1x128xf32>,
    %c3 = arith.constant 3 : index
    %c0_18 = arith.constant 0 : index
    %c0_19 = arith.constant 0 : index
    %17 = vector.load %arg1[%c3, %c0_18, %c0_19] : memref<4x16x128xf32, #tpu.memory_space<vmem>>, vector<1x16x128xf32>
    %18 = vector.shape_cast %17 : vector<1x16x128xf32> to vector<16x128xf32>
    %c55 = arith.constant 55 : index
    %c0_20 = arith.constant 0 : index
    %19 = vector.load %arg7[%c55, %c0_20] : memref<74x128xf32, #tpu.memory_space<vmem>>, vector<16x128xf32>
    tpu.vector_store %arg7[%c55, %c0_20], %18 {strides = array<i32>} : memref<74x128xf32, #tpu.memory_space<vmem>>, vector<16x128xf32>,
    %c71 = arith.constant 71 : index
    %c0_21 = arith.constant 0 : index
    %20 = vector.load %arg7[%c71, %c0_21] : memref<74x128xf32, #tpu.memory_space<vmem>>, vector<1x128xf32>
    tpu.vector_store %arg7[%c71, %c0_21], %0 {strides = array<i32>} : memref<74x128xf32, #tpu.memory_space<vmem>>, vector<1x128xf32>,
    %cst_22 = arith.constant 0.000000e+00 : f32
    %21 = vector.broadcast %cst_22 : f32 to vector<2x128xf32>
    %c72 = arith.constant 72 : index
    %c0_23 = arith.constant 0 : index
    %22 = vector.load %arg7[%c72, %c0_23] : memref<74x128xf32, #tpu.memory_space<vmem>>, vector<2x128xf32>
    tpu.vector_store %arg7[%c72, %c0_23], %21 {strides = array<i32>} : memref<74x128xf32, #tpu.memory_space<vmem>>, vector<2x128xf32>,
    %c0_24 = arith.constant 0 : index
    %c0_25 = arith.constant 0 : index
    %23 = vector.load %arg7[%c0_24, %c0_25] : memref<74x128xf32, #tpu.memory_space<vmem>>, vector<72x128xf32>
    %24 = arith.truncf %23 : vector<72x128xf32> to vector<72x128xbf16>
    %c0_26 = arith.constant 0 : index
    %c0_27 = arith.constant 0 : index
    %25 = vector.load %arg9[%c0_26, %c0_27] : memref<72x384xbf16, #tpu.memory_space<vmem>>, vector<72x128xbf16>
    tpu.vector_store %arg9[%c0_26, %c0_27], %24 {strides = array<i32>} : memref<72x384xbf16, #tpu.memory_space<vmem>>, vector<72x128xbf16>,
    %c1_28 = arith.constant 1 : index
    %c0_29 = arith.constant 0 : index
    %26 = vector.load %arg7[%c1_28, %c0_29] : memref<74x128xf32, #tpu.memory_space<vmem>>, vector<72x128xf32>
    %27 = arith.truncf %26 : vector<72x128xf32> to vector<72x128xbf16>
    %c0_30 = arith.constant 0 : index
    %c128 = arith.constant 128 : index
    %28 = vector.load %arg9[%c0_30, %c128] : memref<72x384xbf16, #tpu.memory_space<vmem>>, vector<72x128xbf16>
    tpu.vector_store %arg9[%c0_30, %c128], %27 {strides = array<i32>} : memref<72x384xbf16, #tpu.memory_space<vmem>>, vector<72x128xbf16>,
    %c2_31 = arith.constant 2 : index
    %c0_32 = arith.constant 0 : index
    %29 = vector.load %arg7[%c2_31, %c0_32] : memref<74x128xf32, #tpu.memory_space<vmem>>, vector<72x128xf32>
    %30 = arith.truncf %29 : vector<72x128xf32> to vector<72x128xbf16>
    %c0_33 = arith.constant 0 : index
    %c256 = arith.constant 256 : index
    %31 = vector.load %arg9[%c0_33, %c256] : memref<72x384xbf16, #tpu.memory_space<vmem>>, vector<72x128xbf16>
    tpu.vector_store %arg9[%c0_33, %c256], %30 {strides = array<i32>} : memref<72x384xbf16, #tpu.memory_space<vmem>>, vector<72x128xbf16>,
    %c0_34 = arith.constant 0 : index
    %c0_35 = arith.constant 0 : index
    %32 = vector.load %arg9[%c0_34, %c0_35] : memref<72x384xbf16, #tpu.memory_space<vmem>>, vector<72x384xbf16>
    %c0_36 = arith.constant 0 : index
    %c0_37 = arith.constant 0 : index
    %33 = vector.load %arg2[%c0_36, %c0_37] : memref<384x128xbf16, #tpu.memory_space<vmem>>, vector<384x128xbf16>
    %cst_38 = arith.constant dense<0.000000e+00> : vector<72x128xf32>
    %34 = tpu.matmul %32, %33, %cst_38 {dimension_numbers = #tpu.dot_dimension_numbers<[1], [0], [0], [1], [0, 0, 1, 1], [], []>} : vector<72x384xbf16>, vector<384x128xbf16>, vector<72x128xf32> -> vector<72x128xf32>
    %c0_39 = arith.constant 0 : index
    %c0_40 = arith.constant 0 : index
    %35 = vector.load %arg4[%c0_39, %c0_40] : memref<1x128xf32, #tpu.memory_space<vmem>>, vector<1x128xf32>
    %36 = vector.broadcast %35 : vector<1x128xf32> to vector<72x128xf32>
    %37 = arith.addf %34, %36 : vector<72x128xf32>
    %cst_41 = arith.constant 0.000000e+00 : f32
    %38 = vector.broadcast %cst_41 : f32 to vector<72x128xf32>
    %39 = arith.maximumf %37, %38 : vector<72x128xf32>
    %c0_42 = arith.constant 0 : index
    %c0_43 = arith.constant 0 : index
    %40 = vector.load %arg8[%c0_42, %c0_43] : memref<74x128xf32, #tpu.memory_space<vmem>>, vector<1x128xf32>
    tpu.vector_store %arg8[%c0_42, %c0_43], %0 {strides = array<i32>} : memref<74x128xf32, #tpu.memory_space<vmem>>, vector<1x128xf32>,
    %41 = vector.extract_strided_slice %39 {offsets = [0, 0], sizes = [16, 128], strides = [1, 1]} : vector<72x128xf32> to vector<16x128xf32>
    %c1_44 = arith.constant 1 : index
    %c0_45 = arith.constant 0 : index
    %42 = vector.load %arg8[%c1_44, %c0_45] : memref<74x128xf32, #tpu.memory_space<vmem>>, vector<16x128xf32>
    tpu.vector_store %arg8[%c1_44, %c0_45], %41 {strides = array<i32>} : memref<74x128xf32, #tpu.memory_space<vmem>>, vector<16x128xf32>,
    %c17_46 = arith.constant 17 : index
    %c0_47 = arith.constant 0 : index
    %43 = vector.load %arg8[%c17_46, %c0_47] : memref<74x128xf32, #tpu.memory_space<vmem>>, vector<1x128xf32>
    tpu.vector_store %arg8[%c17_46, %c0_47], %0 {strides = array<i32>} : memref<74x128xf32, #tpu.memory_space<vmem>>, vector<1x128xf32>,
    %c18_48 = arith.constant 18 : index
    %c0_49 = arith.constant 0 : index
    %44 = vector.load %arg8[%c18_48, %c0_49] : memref<74x128xf32, #tpu.memory_space<vmem>>, vector<1x128xf32>
    tpu.vector_store %arg8[%c18_48, %c0_49], %0 {strides = array<i32>} : memref<74x128xf32, #tpu.memory_space<vmem>>, vector<1x128xf32>,
    %45 = vector.extract_strided_slice %39 {offsets = [18, 0], sizes = [16, 128], strides = [1, 1]} : vector<72x128xf32> to vector<16x128xf32>
    %c19_50 = arith.constant 19 : index
    %c0_51 = arith.constant 0 : index
    %46 = vector.load %arg8[%c19_50, %c0_51] : memref<74x128xf32, #tpu.memory_space<vmem>>, vector<16x128xf32>
    tpu.vector_store %arg8[%c19_50, %c0_51], %45 {strides = array<i32>} : memref<74x128xf32, #tpu.memory_space<vmem>>, vector<16x128xf32>,
    %c35_52 = arith.constant 35 : index
    %c0_53 = arith.constant 0 : index
    %47 = vector.load %arg8[%c35_52, %c0_53] : memref<74x128xf32, #tpu.memory_space<vmem>>, vector<1x128xf32>
    tpu.vector_store %arg8[%c35_52, %c0_53], %0 {strides = array<i32>} : memref<74x128xf32, #tpu.memory_space<vmem>>, vector<1x128xf32>,
    %c36_54 = arith.constant 36 : index
    %c0_55 = arith.constant 0 : index
    %48 = vector.load %arg8[%c36_54, %c0_55] : memref<74x128xf32, #tpu.memory_space<vmem>>, vector<1x128xf32>
    tpu.vector_store %arg8[%c36_54, %c0_55], %0 {strides = array<i32>} : memref<74x128xf32, #tpu.memory_space<vmem>>, vector<1x128xf32>,
    %49 = vector.extract_strided_slice %39 {offsets = [36, 0], sizes = [16, 128], strides = [1, 1]} : vector<72x128xf32> to vector<16x128xf32>
    %c37_56 = arith.constant 37 : index
    %c0_57 = arith.constant 0 : index
    %50 = vector.load %arg8[%c37_56, %c0_57] : memref<74x128xf32, #tpu.memory_space<vmem>>, vector<16x128xf32>
    tpu.vector_store %arg8[%c37_56, %c0_57], %49 {strides = array<i32>} : memref<74x128xf32, #tpu.memory_space<vmem>>, vector<16x128xf32>,
    %c53_58 = arith.constant 53 : index
    %c0_59 = arith.constant 0 : index
    %51 = vector.load %arg8[%c53_58, %c0_59] : memref<74x128xf32, #tpu.memory_space<vmem>>, vector<1x128xf32>
    tpu.vector_store %arg8[%c53_58, %c0_59], %0 {strides = array<i32>} : memref<74x128xf32, #tpu.memory_space<vmem>>, vector<1x128xf32>,
    %c54_60 = arith.constant 54 : index
    %c0_61 = arith.constant 0 : index
    %52 = vector.load %arg8[%c54_60, %c0_61] : memref<74x128xf32, #tpu.memory_space<vmem>>, vector<1x128xf32>
    tpu.vector_store %arg8[%c54_60, %c0_61], %0 {strides = array<i32>} : memref<74x128xf32, #tpu.memory_space<vmem>>, vector<1x128xf32>,
    %53 = vector.extract_strided_slice %39 {offsets = [54, 0], sizes = [16, 128], strides = [1, 1]} : vector<72x128xf32> to vector<16x128xf32>
    %c55_62 = arith.constant 55 : index
    %c0_63 = arith.constant 0 : index
    %54 = vector.load %arg8[%c55_62, %c0_63] : memref<74x128xf32, #tpu.memory_space<vmem>>, vector<16x128xf32>
    tpu.vector_store %arg8[%c55_62, %c0_63], %53 {strides = array<i32>} : memref<74x128xf32, #tpu.memory_space<vmem>>, vector<16x128xf32>,
    %c71_64 = arith.constant 71 : index
    %c0_65 = arith.constant 0 : index
    %55 = vector.load %arg8[%c71_64, %c0_65] : memref<74x128xf32, #tpu.memory_space<vmem>>, vector<1x128xf32>
    tpu.vector_store %arg8[%c71_64, %c0_65], %0 {strides = array<i32>} : memref<74x128xf32, #tpu.memory_space<vmem>>, vector<1x128xf32>,
    %cst_66 = arith.constant 0.000000e+00 : f32
    %56 = vector.broadcast %cst_66 : f32 to vector<2x128xf32>
    %c72_67 = arith.constant 72 : index
    %c0_68 = arith.constant 0 : index
    %57 = vector.load %arg8[%c72_67, %c0_68] : memref<74x128xf32, #tpu.memory_space<vmem>>, vector<2x128xf32>
    tpu.vector_store %arg8[%c72_67, %c0_68], %56 {strides = array<i32>} : memref<74x128xf32, #tpu.memory_space<vmem>>, vector<2x128xf32>,
    %c0_69 = arith.constant 0 : index
    %c0_70 = arith.constant 0 : index
    %58 = vector.load %arg8[%c0_69, %c0_70] : memref<74x128xf32, #tpu.memory_space<vmem>>, vector<72x128xf32>
    %59 = arith.truncf %58 : vector<72x128xf32> to vector<72x128xbf16>
    %c0_71 = arith.constant 0 : index
    %c0_72 = arith.constant 0 : index
    %60 = vector.load %arg9[%c0_71, %c0_72] : memref<72x384xbf16, #tpu.memory_space<vmem>>, vector<72x128xbf16>
    tpu.vector_store %arg9[%c0_71, %c0_72], %59 {strides = array<i32>} : memref<72x384xbf16, #tpu.memory_space<vmem>>, vector<72x128xbf16>,
    %c1_73 = arith.constant 1 : index
    %c0_74 = arith.constant 0 : index
    %61 = vector.load %arg8[%c1_73, %c0_74] : memref<74x128xf32, #tpu.memory_space<vmem>>, vector<72x128xf32>
    %62 = arith.truncf %61 : vector<72x128xf32> to vector<72x128xbf16>
    %c0_75 = arith.constant 0 : index
    %c128_76 = arith.constant 128 : index
    %63 = vector.load %arg9[%c0_75, %c128_76] : memref<72x384xbf16, #tpu.memory_space<vmem>>, vector<72x128xbf16>
    tpu.vector_store %arg9[%c0_75, %c128_76], %62 {strides = array<i32>} : memref<72x384xbf16, #tpu.memory_space<vmem>>, vector<72x128xbf16>,
    %c2_77 = arith.constant 2 : index
    %c0_78 = arith.constant 0 : index
    %64 = vector.load %arg8[%c2_77, %c0_78] : memref<74x128xf32, #tpu.memory_space<vmem>>, vector<72x128xf32>
    %65 = arith.truncf %64 : vector<72x128xf32> to vector<72x128xbf16>
    %c0_79 = arith.constant 0 : index
    %c256_80 = arith.constant 256 : index
    %66 = vector.load %arg9[%c0_79, %c256_80] : memref<72x384xbf16, #tpu.memory_space<vmem>>, vector<72x128xbf16>
    tpu.vector_store %arg9[%c0_79, %c256_80], %65 {strides = array<i32>} : memref<72x384xbf16, #tpu.memory_space<vmem>>, vector<72x128xbf16>,
    %c0_81 = arith.constant 0 : index
    %c0_82 = arith.constant 0 : index
    %67 = vector.load %arg9[%c0_81, %c0_82] : memref<72x384xbf16, #tpu.memory_space<vmem>>, vector<72x384xbf16>
    %c0_83 = arith.constant 0 : index
    %c0_84 = arith.constant 0 : index
    %68 = vector.load %arg3[%c0_83, %c0_84] : memref<384x128xbf16, #tpu.memory_space<vmem>>, vector<384x128xbf16>
    %cst_85 = arith.constant dense<0.000000e+00> : vector<72x128xf32>
    %69 = tpu.matmul %67, %68, %cst_85 {dimension_numbers = #tpu.dot_dimension_numbers<[1], [0], [0], [1], [0, 0, 1, 1], [], []>} : vector<72x384xbf16>, vector<384x128xbf16>, vector<72x128xf32> -> vector<72x128xf32>
    %c0_86 = arith.constant 0 : index
    %c0_87 = arith.constant 0 : index
    %70 = vector.load %arg5[%c0_86, %c0_87] : memref<1x128xf32, #tpu.memory_space<vmem>>, vector<1x128xf32>
    %71 = vector.broadcast %70 : vector<1x128xf32> to vector<72x128xf32>
    %72 = arith.addf %69, %71 : vector<72x128xf32>
    %73 = vector.extract_strided_slice %72 {offsets = [0, 0], sizes = [16, 128], strides = [1, 1]} : vector<72x128xf32> to vector<16x128xf32>
    %c0_88 = arith.constant 0 : index
    %c0_89 = arith.constant 0 : index
    %c0_90 = arith.constant 0 : index
    %74 = vector.load %arg1[%c0_88, %c0_89, %c0_90] : memref<4x16x128xf32, #tpu.memory_space<vmem>>, vector<1x16x128xf32>
    %75 = vector.shape_cast %74 : vector<1x16x128xf32> to vector<16x128xf32>
    %76 = arith.addf %73, %75 : vector<16x128xf32>
    %cst_91 = arith.constant 0.000000e+00 : f32
    %77 = vector.broadcast %cst_91 : f32 to vector<16x128xf32>
    %78 = arith.maximumf %76, %77 : vector<16x128xf32>
    %c0_92 = arith.constant 0 : index
    %c0_93 = arith.constant 0 : index
    %c0_94 = arith.constant 0 : index
    %79 = vector.load %arg6[%c0_92, %c0_93, %c0_94] : memref<4x16x128xf32, #tpu.memory_space<vmem>>, vector<1x16x128xf32>
    %80 = vector.shape_cast %79 : vector<1x16x128xf32> to vector<16x128xf32>
    %81 = vector.shape_cast %78 : vector<16x128xf32> to vector<1x16x128xf32>
    tpu.vector_store %arg6[%c0_92, %c0_93, %c0_94], %81 {strides = array<i32>} : memref<4x16x128xf32, #tpu.memory_space<vmem>>, vector<1x16x128xf32>,
    %82 = vector.extract_strided_slice %72 {offsets = [18, 0], sizes = [16, 128], strides = [1, 1]} : vector<72x128xf32> to vector<16x128xf32>
    %c1_95 = arith.constant 1 : index
    %c0_96 = arith.constant 0 : index
    %c0_97 = arith.constant 0 : index
    %83 = vector.load %arg1[%c1_95, %c0_96, %c0_97] : memref<4x16x128xf32, #tpu.memory_space<vmem>>, vector<1x16x128xf32>
    %84 = vector.shape_cast %83 : vector<1x16x128xf32> to vector<16x128xf32>
    %85 = arith.addf %82, %84 : vector<16x128xf32>
    %cst_98 = arith.constant 0.000000e+00 : f32
    %86 = vector.broadcast %cst_98 : f32 to vector<16x128xf32>
    %87 = arith.maximumf %85, %86 : vector<16x128xf32>
    %c1_99 = arith.constant 1 : index
    %c0_100 = arith.constant 0 : index
    %c0_101 = arith.constant 0 : index
    %88 = vector.load %arg6[%c1_99, %c0_100, %c0_101] : memref<4x16x128xf32, #tpu.memory_space<vmem>>, vector<1x16x128xf32>
    %89 = vector.shape_cast %88 : vector<1x16x128xf32> to vector<16x128xf32>
    %90 = vector.shape_cast %87 : vector<16x128xf32> to vector<1x16x128xf32>
    tpu.vector_store %arg6[%c1_99, %c0_100, %c0_101], %90 {strides = array<i32>} : memref<4x16x128xf32, #tpu.memory_space<vmem>>, vector<1x16x128xf32>,
    %91 = vector.extract_strided_slice %72 {offsets = [36, 0], sizes = [16, 128], strides = [1, 1]} : vector<72x128xf32> to vector<16x128xf32>
    %c2_102 = arith.constant 2 : index
    %c0_103 = arith.constant 0 : index
    %c0_104 = arith.constant 0 : index
    %92 = vector.load %arg1[%c2_102, %c0_103, %c0_104] : memref<4x16x128xf32, #tpu.memory_space<vmem>>, vector<1x16x128xf32>
    %93 = vector.shape_cast %92 : vector<1x16x128xf32> to vector<16x128xf32>
    %94 = arith.addf %91, %93 : vector<16x128xf32>
    %cst_105 = arith.constant 0.000000e+00 : f32
    %95 = vector.broadcast %cst_105 : f32 to vector<16x128xf32>
    %96 = arith.maximumf %94, %95 : vector<16x128xf32>
    %c2_106 = arith.constant 2 : index
    %c0_107 = arith.constant 0 : index
    %c0_108 = arith.constant 0 : index
    %97 = vector.load %arg6[%c2_106, %c0_107, %c0_108] : memref<4x16x128xf32, #tpu.memory_space<vmem>>, vector<1x16x128xf32>
    %98 = vector.shape_cast %97 : vector<1x16x128xf32> to vector<16x128xf32>
    %99 = vector.shape_cast %96 : vector<16x128xf32> to vector<1x16x128xf32>
    tpu.vector_store %arg6[%c2_106, %c0_107, %c0_108], %99 {strides = array<i32>} : memref<4x16x128xf32, #tpu.memory_space<vmem>>, vector<1x16x128xf32>,
    %100 = vector.extract_strided_slice %72 {offsets = [54, 0], sizes = [16, 128], strides = [1, 1]} : vector<72x128xf32> to vector<16x128xf32>
    %c3_109 = arith.constant 3 : index
    %c0_110 = arith.constant 0 : index
    %c0_111 = arith.constant 0 : index
    %101 = vector.load %arg1[%c3_109, %c0_110, %c0_111] : memref<4x16x128xf32, #tpu.memory_space<vmem>>, vector<1x16x128xf32>
    %102 = vector.shape_cast %101 : vector<1x16x128xf32> to vector<16x128xf32>
    %103 = arith.addf %100, %102 : vector<16x128xf32>
    %cst_112 = arith.constant 0.000000e+00 : f32
    %104 = vector.broadcast %cst_112 : f32 to vector<16x128xf32>
    %105 = arith.maximumf %103, %104 : vector<16x128xf32>
    %c3_113 = arith.constant 3 : index
    %c0_114 = arith.constant 0 : index
    %c0_115 = arith.constant 0 : index
    %106 = vector.load %arg6[%c3_113, %c0_114, %c0_115] : memref<4x16x128xf32, #tpu.memory_space<vmem>>, vector<1x16x128xf32>
    %107 = vector.shape_cast %106 : vector<1x16x128xf32> to vector<16x128xf32>
    %108 = vector.shape_cast %105 : vector<16x128xf32> to vector<1x16x128xf32>
    tpu.vector_store %arg6[%c3_113, %c0_114, %c0_115], %108 {strides = array<i32>} : memref<4x16x128xf32, #tpu.memory_space<vmem>>, vector<1x16x128xf32>,
    return
  }
  func.func @transform_0(%arg0: i32) -> (i32, i32, i32) {
    %c0_i32 = arith.constant 0 : i32
    %c0_i32_0 = arith.constant 0 : i32
    %c0_i32_1 = arith.constant 0 : i32
    return %arg0, %c0_i32, %c0_i32_0 : i32, i32, i32
  }
  func.func @transform_1(%arg0: i32) -> (i32, i32) {
    %c0_i32 = arith.constant 0 : i32
    %c0_i32_0 = arith.constant 0 : i32
    %c0_i32_1 = arith.constant 0 : i32
    return %c0_i32, %c0_i32_0 : i32, i32
  }
  func.func @transform_2(%arg0: i32) -> (i32, i32) {
    %c0_i32 = arith.constant 0 : i32
    %c0_i32_0 = arith.constant 0 : i32
    %c0_i32_1 = arith.constant 0 : i32
    return %c0_i32, %c0_i32_0 : i32, i32
  }
  func.func @transform_3(%arg0: i32) -> (i32, i32) {
    %c0_i32 = arith.constant 0 : i32
    %c0_i32_0 = arith.constant 0 : i32
    %c0_i32_1 = arith.constant 0 : i32
    return %c0_i32, %c0_i32_0 : i32, i32
  }
  func.func @transform_4(%arg0: i32) -> (i32, i32) {
    %c0_i32 = arith.constant 0 : i32
    %c0_i32_0 = arith.constant 0 : i32
    %c0_i32_1 = arith.constant 0 : i32
    return %c0_i32, %c0_i32_0 : i32, i32
  }
  func.func @transform_5(%arg0: i32) -> (i32, i32, i32) {
    %c0_i32 = arith.constant 0 : i32
    %c0_i32_0 = arith.constant 0 : i32
    %c0_i32_1 = arith.constant 0 : i32
    return %arg0, %c0_i32, %c0_i32_0 : i32, i32, i32
  }
}

</mosaic_0001>

<bundles_post_ra>
// kernel: tile.23
= control target key start
LH: loop header
LB: loop body
LE: loop exit
PB: predicated region body
PF: predicated region fallthrough
CT: control target
= control target key end

     0   :  { %s28_s0 = inlined_call_operand.vmem [shape: f32[8], index: 0, kind: input, shape index: {}]   ;;  %s29_s1 = inlined_call_operand.vmem [shape: f32[16,8], index: 1, kind: output, shape index: {}]  }
   0x1   :  { %v4_v0 = vld [vmem:[%s28_s0] ss:$0 sm:$0xff] }
   0x2   :  { %5 = vst [vmem:[%s29_s1] sm:$0xff] %v4_v0  ;;  %8 = vst [vmem:[%s29_s1 + $0x8] sm:$0xff] %v4_v0 }

// kernel: mul.13
= control target key start
LH: loop header
LB: loop body
LE: loop exit
PB: predicated region body
PF: predicated region fallthrough
CT: control target
= control target key end

     0   :  { %s131_s10 = smov 120   ;;  %s132_s11 = smov 104   ;;  %vm3_vm0 = vcmask 64512   ;;  %vm9_vm1 = vcmask 1048512   ;;  %vm15_vm2 = vcmask 982912   ;;  %vm21_vm3 = vcmask 917312   ;;  %s207_s0 = inlined_call_operand.vmem [shape: f32[16,8], index: 0, kind: input, shape index: {}]   ;;  %s208_s1 = inlined_call_operand.vmem [shape: f32[128], index: 1, kind: output, shape index: {}]  }
   0x1   :  { %v101_v0 = vld [vmem:[%s207_s0 + $0xf] sm:$0x1]   ;;  %v103_v1 = vld [vmem:[%s207_s0 + $0xd] sm:$0x1]   ;;  %v102_v2 = vld [vmem:[%s207_s0 + $0xe] sm:$0x1]  }
   0x2   :  { %7 = vrot.lane.b32.xlu0 %v101_v0, %s131_s10  ;;  %19 = vrot.lane.b32.xlu1 %v103_v1, %s132_s11  ;;  %v104_v3 = vld [vmem:[%s207_s0 + $0xc] sm:$0x1]   ;;  %s133_s16 = smov 112   ;;  %s134_s17 = smov 96   ;;  %v105_v4 = vld [vmem:[%s207_s0 + $0xb] sm:$0x1]  }
   0x3   :  { %v106_v5 = vld [vmem:[%s207_s0 + $0xa] sm:$0x1]   ;;  %v2_v6 = vld [vmem:[%s207_s0] sm:$0x1]   ;;  %s135_s24 = smov 88   ;;  %s136_s25 = smov 80  }
   0x4   :  { %4 = vst.msk [vmem:[#allocation0] sm:$0x1] %vm3_vm0, %v2_v6   ;;  %v107_v7 = vld [vmem:[%s207_s0 + $0x9] sm:$0x1]   ;;  %v108_v8 = vld [vmem:[%s207_s0 + $0x8] sm:$0x1]  }
   0x5   :  { %s137_s30 = smov 72   ;;  %s138_s2 = smov 64   ;;  %v109_v9 = vld [vmem:[%s207_s0 + $0x7] sm:$0x1]   ;;  %v110_v10 = vld [vmem:[%s207_s0 + $0x6] sm:$0x1]  }
   0x6   :  { %13 = vrot.lane.b32.xlu0 %v102_v2, %s133_s16  ;;  %25 = vrot.lane.b32.xlu1 %v104_v3, %s134_s17  ;;  %s139_s7 = smov 56   ;;  %s140_s8 = smov 48   ;;  %v111_v11 = vld [vmem:[%s207_s0 + $0x5] sm:$0x1]   ;;  %v112_v12 = vld [vmem:[%s207_s0 + $0x4] sm:$0x1]  }
   0x7   :  { %s141_s13 = smov 40   ;;  %s142_s14 = smov 32   ;;  %v113_v13 = vld [vmem:[%s207_s0 + $0x3] sm:$0x1]   ;;  %v114_v14 = vld [vmem:[%s207_s0 + $0x2] sm:$0x1]  }
   0x8   :  { %s143_s19 = smov 24   ;;  %s144_s20 = smov 16   ;;  %v115_v15 = vld [vmem:[%s207_s0 + $0x1] sm:$0x1]   ;;  %vm27_vm4 = vcmask 851712   ;;  %vm33_vm5 = vcmask 786112  }
   0x9   :  { %s145_s0 = smov 8   ;;  %vm39_vm6 = vcmask 720512   ;;  %vm45_vm7 = vcmask 654912   ;;  %vm51_vm8 = vcmask 589312   ;;  %vm57_vm9 = vcmask 523712  }
   0xa   :  { %31 = vrot.lane.b32.xlu0 %v105_v4, %s135_s24  ;;  %37 = vrot.lane.b32.xlu1 %v106_v5, %s136_s25  ;;  %vm63_vm10 = vcmask 458112   ;;  %vm69_vm11 = vcmask 392512   ;;  %vm75_vm12 = vcmask 326912   ;;  %vm81_vm13 = vcmask 261312  }
   0xb   :  { %vm87_vm14 = vcmask 195712   ;;  %vm93_vm15 = vcmask 130112  }
   0xe   :  { %43 = vrot.lane.b32.xlu0 %v107_v7, %s137_s30  ;;  %49 = vrot.lane.b32.xlu1 %v108_v8, %s138_s2 }
  0x12   :  { %55 = vrot.lane.b32.xlu0 %v109_v9, %s139_s7  ;;  %61 = vrot.lane.b32.xlu1 %v110_v10, %s140_s8 }
  0x16   :  { %67 = vrot.lane.b32.xlu0 %v111_v11, %s141_s13  ;;  %73 = vrot.lane.b32.xlu1 %v112_v12, %s142_s14 }
  0x1a   :  { %79 = vrot.lane.b32.xlu0 %v113_v13, %s143_s19  ;;  %85 = vrot.lane.b32.xlu1 %v114_v14, %s144_s20 }
  0x1e   :  { %91 = vrot.lane.b32.xlu0 %v115_v15, %s145_s0 }
  0x74   :  { %v8_v16 = vpop.permute.xlu0 %7   ;;  %v20_v17 = vpop.permute.xlu1 %19  }
  0x75   :  { %10 = vst.msk [vmem:[#allocation0] sm:$0x1] %vm9_vm1, %v8_v16  }
  0x78   :  { %v14_v18 = vpop.permute.xlu0 %13   ;;  %v26_v19 = vpop.permute.xlu1 %25  }
  0x79   :  { %16 = vst.msk [vmem:[#allocation0] sm:$0x1] %vm15_vm2, %v14_v18  }
  0x7a   :  { %22 = vst.msk [vmem:[#allocation0] sm:$0x1] %vm21_vm3, %v20_v17  }
  0x7b   :  { %28 = vst.msk [vmem:[#allocation0] sm:$0x1] %vm27_vm4, %v26_v19  }
  0x7c   :  { %v32_v20 = vpop.permute.xlu0 %31   ;;  %v38_v21 = vpop.permute.xlu1 %37  }
  0x7d   :  { %34 = vst.msk [vmem:[#allocation0] sm:$0x1] %vm33_vm5, %v32_v20  }
  0x7e   :  { %40 = vst.msk [vmem:[#allocation0] sm:$0x1] %vm39_vm6, %v38_v21  }
  0x80   :  { %v44_v22 = vpop.permute.xlu0 %43   ;;  %v50_v23 = vpop.permute.xlu1 %49  }
  0x81   :  { %46 = vst.msk [vmem:[#allocation0] sm:$0x1] %vm45_vm7, %v44_v22  }
  0x82   :  { %52 = vst.msk [vmem:[#allocation0] sm:$0x1] %vm51_vm8, %v50_v23  }
  0x84   :  { %v56_v24 = vpop.permute.xlu0 %55   ;;  %v62_v25 = vpop.permute.xlu1 %61  }
  0x85   :  { %58 = vst.msk [vmem:[#allocation0] sm:$0x1] %vm57_vm9, %v56_v24  }
  0x86   :  { %64 = vst.msk [vmem:[#allocation0] sm:$0x1] %vm63_vm10, %v62_v25  }
  0x88   :  { %v68_v26 = vpop.permute.xlu0 %67   ;;  %v74_v27 = vpop.permute.xlu1 %73  }
  0x89   :  { %70 = vst.msk [vmem:[#allocation0] sm:$0x1] %vm69_vm11, %v68_v26  }
  0x8a   :  { %76 = vst.msk [vmem:[#allocation0] sm:$0x1] %vm75_vm12, %v74_v27  }
  0x8c   :  { %v80_v28 = vpop.permute.xlu0 %79   ;;  %v86_v29 = vpop.permute.xlu1 %85  }
  0x8d   :  { %82 = vst.msk [vmem:[#allocation0] sm:$0x1] %vm81_vm13, %v80_v28  }
  0x8e   :  { %88 = vst.msk [vmem:[#allocation0] sm:$0x1] %vm87_vm14, %v86_v29  }
  0x90   :  { %v92_v30 = vpop.permute.xlu0 %91  }
  0x91   :  { %94 = vst.msk [vmem:[#allocation0] sm:$0x1] %vm93_vm15, %v92_v30  }
  0x98   :  { %v98_v31 = vld [vmem:[#allocation0] sm:$0x1] }
  0x99   :  { %100 = vst [vmem:[%s208_s1] sm:$0x1] %v98_v31 }

// kernel: tile.34
= control target key start
LH: loop header
LB: loop body
LE: loop exit
PB: predicated region body
PF: predicated region fallthrough
CT: control target
= control target key end

     0   :  { %s131_s10 = smov 120   ;;  %s132_s11 = smov 104   ;;  %vm3_vm0 = vcmask 64512   ;;  %vm9_vm1 = vcmask 1048512   ;;  %vm15_vm2 = vcmask 982912   ;;  %vm21_vm3 = vcmask 917312   ;;  %s207_s0 = inlined_call_operand.vmem [shape: f32[16,8], index: 0, kind: input, shape index: {}]   ;;  %s208_s1 = inlined_call_operand.vmem [shape: f32[1,128], index: 1, kind: output, shape index: {}]  }
   0x1   :  { %v101_v0 = vld [vmem:[%s207_s0 + $0xf] sm:$0x1]   ;;  %v103_v1 = vld [vmem:[%s207_s0 + $0xd] sm:$0x1]   ;;  %v102_v2 = vld [vmem:[%s207_s0 + $0xe] sm:$0x1]  }
   0x2   :  { %7 = vrot.lane.b32.xlu0 %v101_v0, %s131_s10  ;;  %19 = vrot.lane.b32.xlu1 %v103_v1, %s132_s11  ;;  %v104_v3 = vld [vmem:[%s207_s0 + $0xc] sm:$0x1]   ;;  %s133_s16 = smov 112   ;;  %s134_s17 = smov 96   ;;  %v105_v4 = vld [vmem:[%s207_s0 + $0xb] sm:$0x1]  }
   0x3   :  { %v106_v5 = vld [vmem:[%s207_s0 + $0xa] sm:$0x1]   ;;  %v2_v6 = vld [vmem:[%s207_s0] sm:$0x1]   ;;  %s135_s24 = smov 88   ;;  %s136_s25 = smov 80  }
   0x4   :  { %4 = vst.msk [vmem:[#allocation0] sm:$0x1] %vm3_vm0, %v2_v6   ;;  %v107_v7 = vld [vmem:[%s207_s0 + $0x9] sm:$0x1]   ;;  %v108_v8 = vld [vmem:[%s207_s0 + $0x8] sm:$0x1]  }
   0x5   :  { %s137_s30 = smov 72   ;;  %s138_s2 = smov 64   ;;  %v109_v9 = vld [vmem:[%s207_s0 + $0x7] sm:$0x1]   ;;  %v110_v10 = vld [vmem:[%s207_s0 + $0x6] sm:$0x1]  }
   0x6   :  { %13 = vrot.lane.b32.xlu0 %v102_v2, %s133_s16  ;;  %25 = vrot.lane.b32.xlu1 %v104_v3, %s134_s17  ;;  %s139_s7 = smov 56   ;;  %s140_s8 = smov 48   ;;  %v111_v11 = vld [vmem:[%s207_s0 + $0x5] sm:$0x1]   ;;  %v112_v12 = vld [vmem:[%s207_s0 + $0x4] sm:$0x1]  }
   0x7   :  { %s141_s13 = smov 40   ;;  %s142_s14 = smov 32   ;;  %v113_v13 = vld [vmem:[%s207_s0 + $0x3] sm:$0x1]   ;;  %v114_v14 = vld [vmem:[%s207_s0 + $0x2] sm:$0x1]  }
   0x8   :  { %s143_s19 = smov 24   ;;  %s144_s20 = smov 16   ;;  %v115_v15 = vld [vmem:[%s207_s0 + $0x1] sm:$0x1]   ;;  %vm27_vm4 = vcmask 851712   ;;  %vm33_vm5 = vcmask 786112  }
   0x9   :  { %s145_s0 = smov 8   ;;  %vm39_vm6 = vcmask 720512   ;;  %vm45_vm7 = vcmask 654912   ;;  %vm51_vm8 = vcmask 589312   ;;  %vm57_vm9 = vcmask 523712  }
   0xa   :  { %31 = vrot.lane.b32.xlu0 %v105_v4, %s135_s24  ;;  %37 = vrot.lane.b32.xlu1 %v106_v5, %s136_s25  ;;  %vm63_vm10 = vcmask 458112   ;;  %vm69_vm11 = vcmask 392512   ;;  %vm75_vm12 = vcmask 326912   ;;  %vm81_vm13 = vcmask 261312  }
   0xb   :  { %vm87_vm14 = vcmask 195712   ;;  %vm93_vm15 = vcmask 130112  }
   0xe   :  { %43 = vrot.lane.b32.xlu0 %v107_v7, %s137_s30  ;;  %49 = vrot.lane.b32.xlu1 %v108_v8, %s138_s2 }
  0x12   :  { %55 = vrot.lane.b32.xlu0 %v109_v9, %s139_s7  ;;  %61 = vrot.lane.b32.xlu1 %v110_v10, %s140_s8 }
  0x16   :  { %67 = vrot.lane.b32.xlu0 %v111_v11, %s141_s13  ;;  %73 = vrot.lane.b32.xlu1 %v112_v12, %s142_s14 }
  0x1a   :  { %79 = vrot.lane.b32.xlu0 %v113_v13, %s143_s19  ;;  %85 = vrot.lane.b32.xlu1 %v114_v14, %s144_s20 }
  0x1e   :  { %91 = vrot.lane.b32.xlu0 %v115_v15, %s145_s0 }
  0x74   :  { %v8_v16 = vpop.permute.xlu0 %7   ;;  %v20_v17 = vpop.permute.xlu1 %19  }
  0x75   :  { %10 = vst.msk [vmem:[#allocation0] sm:$0x1] %vm9_vm1, %v8_v16  }
  0x78   :  { %v14_v18 = vpop.permute.xlu0 %13   ;;  %v26_v19 = vpop.permute.xlu1 %25  }
  0x79   :  { %16 = vst.msk [vmem:[#allocation0] sm:$0x1] %vm15_vm2, %v14_v18  }
  0x7a   :  { %22 = vst.msk [vmem:[#allocation0] sm:$0x1] %vm21_vm3, %v20_v17  }
  0x7b   :  { %28 = vst.msk [vmem:[#allocation0] sm:$0x1] %vm27_vm4, %v26_v19  }
  0x7c   :  { %v32_v20 = vpop.permute.xlu0 %31   ;;  %v38_v21 = vpop.permute.xlu1 %37  }
  0x7d   :  { %34 = vst.msk [vmem:[#allocation0] sm:$0x1] %vm33_vm5, %v32_v20  }
  0x7e   :  { %40 = vst.msk [vmem:[#allocation0] sm:$0x1] %vm39_vm6, %v38_v21  }
  0x80   :  { %v44_v22 = vpop.permute.xlu0 %43   ;;  %v50_v23 = vpop.permute.xlu1 %49  }
  0x81   :  { %46 = vst.msk [vmem:[#allocation0] sm:$0x1] %vm45_vm7, %v44_v22  }
  0x82   :  { %52 = vst.msk [vmem:[#allocation0] sm:$0x1] %vm51_vm8, %v50_v23  }
  0x84   :  { %v56_v24 = vpop.permute.xlu0 %55   ;;  %v62_v25 = vpop.permute.xlu1 %61  }
  0x85   :  { %58 = vst.msk [vmem:[#allocation0] sm:$0x1] %vm57_vm9, %v56_v24  }
  0x86   :  { %64 = vst.msk [vmem:[#allocation0] sm:$0x1] %vm63_vm10, %v62_v25  }
  0x88   :  { %v68_v26 = vpop.permute.xlu0 %67   ;;  %v74_v27 = vpop.permute.xlu1 %73  }
  0x89   :  { %70 = vst.msk [vmem:[#allocation0] sm:$0x1] %vm69_vm11, %v68_v26  }
  0x8a   :  { %76 = vst.msk [vmem:[#allocation0] sm:$0x1] %vm75_vm12, %v74_v27  }
  0x8c   :  { %v80_v28 = vpop.permute.xlu0 %79   ;;  %v86_v29 = vpop.permute.xlu1 %85  }
  0x8d   :  { %82 = vst.msk [vmem:[#allocation0] sm:$0x1] %vm81_vm13, %v80_v28  }
  0x8e   :  { %88 = vst.msk [vmem:[#allocation0] sm:$0x1] %vm87_vm14, %v86_v29  }
  0x90   :  { %v92_v30 = vpop.permute.xlu0 %91  }
  0x91   :  { %94 = vst.msk [vmem:[#allocation0] sm:$0x1] %vm93_vm15, %v92_v30  }
  0x98   :  { %v98_v31 = vld [vmem:[#allocation0] sm:$0x1] }
  0x99   :  { %100 = vst [vmem:[%s208_s1] sm:$0x1] %v98_v31 }

// kernel: trans_basic_block_nhwc.1
= control target key start
LH: loop header
LB: loop body
LE: loop exit
PB: predicated region body
PF: predicated region fallthrough
CT: control target
= control target key end

     0   :  { %s2174_s18 = smov 0   ;;  %s2467_s0 = inlined_call_operand.vmem [shape: f32[8,16,128], index: 0, kind: input, shape index: {}]   ;;  %s2468_s1 = inlined_call_operand.vmem [shape: bf16[384,128], index: 1, kind: input, shape index: {}]   ;;  %s2469_s2 = inlined_call_operand.vmem [shape: bf16[384,128], index: 2, kind: input, shape index: {}]   ;;  %s2470_s3 = inlined_call_operand.vmem [shape: f32[1,128], index: 3, kind: input, shape index: {}]   ;;  %s2471_s4 = inlined_call_operand.vmem [shape: f32[1,128], index: 4, kind: input, shape index: {}]   ;;  %s2472_s5 = inlined_call_operand.vmem [shape: f32[8,16,128], index: 5, kind: output, shape index: {}]  }
   0x1 LB: > { %s1622_s19 = sadd.s32 4294967295, %s2140_s18   ;;  %p1626_p0 = scmp.ge.s32.totalorder %s2140_s18, 1  ;;  %s2140_s18 = sphi %s2174_s18, %s15_s18  }
   0x2   : > { %p189_p1 = scmp.lt.s32.totalorder %s2140_s18, 3 }
   0x4   : > { %p190_p2 = pnand %p1626_p0, %p189_p1 }
   0x5   : > { %v2046_v0 = vld [vmem:[%s2468_s1 + $0x40] sm:$0xff] (!%p190_p2)   ;;  %v2142_v2 = vmov (!%p190_p2), 0.0   ;;  %v2049_v4 = vld [vmem:[%s2468_s1 + $0x48] sm:$0xff] (!%p190_p2)   ;;  %vm2143_vm0 = vmmov (!%p190_p2), 0   ;;  %v2052_v7 = vld [vmem:[%s2468_s1 + $0x50] sm:$0xff] (!%p190_p2)   ;;  %s1627_s9 = sshll.u32 (!%p190_p2), %s1622_s19, 2 }
   0x6   : > { %193 = sbr.rel (%p190_p2) target bundleno = 540 (0x21c), region = 40  ;;  %v2047_v1 = vld [vmem:[%s2468_s1] sm:$0xff] (!%p190_p2)   ;;  %1964 = vmatprep.subr.bf16.mxu1 (!%p190_p2), %v2142_v2  ;;  %234 = vst [vmem:[#allocation2] sm:$0x1] (!%p190_p2), %v2142_v2  ;;  %239 = vst [vmem:[#allocation2 + $0x11] sm:$0x1] (!%p190_p2), %v2142_v2  ;;  %1846 = vmatprep.subr.bf16.mxu0 (!%p190_p2), %v2046_v0 }
   0x7   : > { %240 = vst [vmem:[#allocation2 + $0x12] sm:$0x1] (!%p190_p2), %v2142_v2  ;;  %246 = vst [vmem:[#allocation2 + $0x23] sm:$0x1] (!%p190_p2), %v2142_v2  ;;  %v2048_v3 = vld [vmem:[%s2468_s1 + $0x80] sm:$0xff] (!%p190_p2)   ;;  %1847 = vmatpush3.bf16.msra.mxu0 (!%p190_p2), %v2047_v1  ;;  %v2050_v5 = vld [vmem:[%s2468_s1 + $0x8] sm:$0xff] (!%p190_p2)   ;;  %1980 = vmatprep.mubr.msk.bf16.mxu1 (!%p190_p2), %vm2143_vm0, %v2142_v2 }
   0x8   : > { %247 = vst [vmem:[#allocation2 + $0x24] sm:$0x1] (!%p190_p2), %v2142_v2  ;;  %253 = vst [vmem:[#allocation2 + $0x35] sm:$0x1] (!%p190_p2), %v2142_v2  ;;  %1965 = vmatpush3.bf16.msra.mxu1 (!%p190_p2), %v2048_v3  ;;  %1848 = vmatprep.subr.bf16.mxu0 (!%p190_p2), %v2049_v4  ;;  %v2051_v6 = vld [vmem:[%s2468_s1 + $0x88] sm:$0xff] (!%p190_p2)   ;;  %v2053_v8 = vld [vmem:[%s2468_s1 + $0x10] sm:$0xff] (!%p190_p2)  }
   0x9   : > { %254 = vst [vmem:[#allocation2 + $0x36] sm:$0x1] (!%p190_p2), %v2142_v2  ;;  %260 = vst [vmem:[#allocation2 + $0x47] sm:$0x1] (!%p190_p2), %v2142_v2  ;;  %1966 = vmatprep.subr.bf16.mxu1 (!%p190_p2), %v2142_v2  ;;  %v2054_v9 = vld [vmem:[%s2468_s1 + $0x90] sm:$0xff] (!%p190_p2)   ;;  %v2055_v10 = vld [vmem:[%s2468_s1 + $0x58] sm:$0xff] (!%p190_p2)  }
   0xa   : > { %261 = vst [vmem:[#allocation2 + $0x48] sm:$0x3] (!%p190_p2), %v2142_v2  ;;  %872 = vst [vmem:[#allocation3] sm:$0x1] (!%p190_p2), %v2142_v2  ;;  %p220_p3 = scmp.lt.s32.totalorder (!%p190_p2), %s1627_s9, 7  ;;  %v2056_v11 = vld [vmem:[%s2468_s1 + $0x18] sm:$0xff] (!%p190_p2)  }
   0xb   : > { %875 = vst [vmem:[#allocation3 + $0x11] sm:$0x1] (!%p190_p2), %v2142_v2  ;;  %876 = vst [vmem:[#allocation3 + $0x12] sm:$0x1] (!%p190_p2), %v2142_v2  ;;  %1849 = vmatpush3.bf16.msra.mxu0 (!%p190_p2), %v2050_v5  ;;  %v2057_v12 = vld [vmem:[%s2468_s1 + $0x98] sm:$0xff] (!%p190_p2)   ;;  %v2058_v13 = vld [vmem:[%s2468_s1 + $0x60] sm:$0xff] (!%p190_p2)  }
   0xc   : > { %880 = vst [vmem:[#allocation3 + $0x23] sm:$0x1] (!%p190_p2), %v2142_v2  ;;  %881 = vst [vmem:[#allocation3 + $0x24] sm:$0x1] (!%p190_p2), %v2142_v2  ;;  %1967 = vmatpush3.bf16.msra.mxu1 (!%p190_p2), %v2051_v6  ;;  %1850 = vmatprep.subr.bf16.mxu0 (!%p190_p2), %v2052_v7  ;;  %v2059_v14 = vld [vmem:[%s2468_s1 + $0x20] sm:$0xff] (!%p190_p2)   ;;  %v2061_v16 = vld [vmem:[%s2468_s1 + $0x68] sm:$0xff] (!%p190_p2)  }
   0xd   : > { %885 = vst [vmem:[#allocation3 + $0x35] sm:$0x1] %v2142_v2  ;;  %886 = vst [vmem:[#allocation3 + $0x36] sm:$0x1] %v2142_v2  ;;  %1968 = vmatprep.subr.bf16.mxu1 %v2142_v2  ;;  %s2474_s9 = smov (!%p220_p3, %s1627_s9), 7  ;;  %v2060_v15 = vld [vmem:[%s2468_s1 + $0xa0] sm:$0xff]  }
   0xe   : > { %890 = vst [vmem:[#allocation3 + $0x47] sm:$0x1] %v2142_v2  ;;  %891 = vst [vmem:[#allocation3 + $0x48] sm:$0x3] %v2142_v2  ;;  %s1790_s29 = sshll.u32 %s2474_s9, 4  ;;  %v2062_v17 = vld [vmem:[%s2468_s1 + $0x28] sm:$0xff]  }
   0xf   : > { %1851 = vmatpush3.bf16.msra.mxu0 %v2053_v8  ;;  %v2063_v18 = vld [vmem:[%s2468_s1 + $0xa8] sm:$0xff]   ;;  %v2064_v19 = vld [vmem:[%s2468_s1 + $0x70] sm:$0xff]   ;;  %s224_s14 = scalar_lea.vmem %s2467_s0, %s1790_s29  ;;  %v2067_v24 = vld [vmem:[%s2468_s1 + $0x78] sm:$0xff]   ;;  %s2439_s13 = scalar_lea.vmem %s2472_s5, %s1790_s29  ;;  %vm1505_vm1 = vcmask 1041408   ;;  %vm1526_vm2 = vcmask 1043456   ;;  %vm1547_vm3 = vcmask 1045504  }
  0x10   : > { %1969 = vmatpush3.bf16.msra.mxu1 %v2054_v9  ;;  %1852 = vmatprep.subr.bf16.mxu0 %v2055_v10  ;;  %v2065_v20 = vld [vmem:[%s2468_s1 + $0x30] sm:$0xff]   ;;  %v2281_v22 = vld [vmem:[%s224_s14] sm:$0xff]  ;;  %v2283_v23 = vld [vmem:[%s224_s14 + $0x8] sm:$0xff] }
  0x11   : > { %1970 = vmatprep.subr.bf16.mxu1 %v2142_v2  ;;  %v2066_v21 = vld [vmem:[%s2468_s1 + $0xb0] sm:$0xff]   ;;  %237 = vst [vmem:[#allocation2 + $0x1] sm:$0xff] %v2281_v22  ;;  %238 = vst [vmem:[#allocation2 + $0x9] sm:$0xff] %v2283_v23  ;;  %v1801_v25 = vpack.c.bf16 %v2281_v22, %v2281_v22  ;;  %v1802_v26 = vpack.c.bf16 %v2283_v23, %v2283_v23  ;;  %v2068_v28 = vld [vmem:[%s2468_s1 + $0x38] sm:$0xff]  }
  0x12   : > { %v2294_v27 = vld [vmem:[%s224_s14 + $0x10] sm:$0xff]  ;;  %v2300_v29 = vld [vmem:[%s224_s14 + $0x18] sm:$0xff]  ;;  %v2303_v30 = vld [vmem:[%s224_s14 + $0x20] sm:$0xff] }
  0x13   : > { %1853 = vmatpush3.bf16.msra.mxu0 %v2056_v11  ;;  %244 = vst [vmem:[#allocation2 + $0x13] sm:$0xff] %v2294_v27  ;;  %v2305_v31 = vld [vmem:[%s224_s14 + $0x28] sm:$0xff]  ;;  %363 = vst [vmem:[#allocation4 + $0x4] sm:$0xf] %v1801_v25  ;;  %v1637_v32 = vld [vmem:[%s224_s14 + $0x30] sm:$0xff] }
  0x14   : > { %1971 = vmatpush3.bf16.msra.mxu1 %v2057_v12  ;;  %1854 = vmatprep.subr.bf16.mxu0 %v2058_v13  ;;  %364 = vst [vmem:[#allocation4 + $0x10] sm:$0xf] %v1802_v26  ;;  %245 = vst [vmem:[#allocation2 + $0x1b] sm:$0xff] %v2300_v29  ;;  %v1638_v33 = vld [vmem:[%s224_s14 + $0x38] sm:$0xff]  ;;  %v2089_v35 = vld [vmem:[%s2469_s2 + $0x40] sm:$0xff]  }
  0x15   : > { %1972 = vmatprep.subr.bf16.mxu1 %v2142_v2  ;;  %251 = vst [vmem:[#allocation2 + $0x25] sm:$0xff] %v2303_v30  ;;  %252 = vst [vmem:[#allocation2 + $0x2d] sm:$0xff] %v2305_v31  ;;  %v2071_v34 = vld [vmem:[%s2468_s1 + $0xb8] sm:$0xff]  }
  0x16   : > { %258 = vst [vmem:[#allocation2 + $0x37] sm:$0xff] %v1637_v32  ;;  %259 = vst [vmem:[#allocation2 + $0x3f] sm:$0xff] %v1638_v33  ;;  %v2093_v32 = vld [vmem:[%s2469_s2 + $0x80] sm:$0xff]  }
  0x17   : > { %1855 = vmatpush3.bf16.msra.mxu0 %v2059_v14 }
  0x18   : > { %1973 = vmatpush3.bf16.msra.mxu1 %v2060_v15  ;;  %1856 = vmatprep.subr.bf16.mxu0 %v2061_v16  ;;  %v262_v36 = vld [vmem:[#allocation2] sm:$0xff]  ;;  %v263_v37 = vld [vmem:[#allocation2 + $0x8] sm:$0xff] }
  0x19   : > { %1974 = vmatprep.subr.bf16.mxu1 %v2142_v2  ;;  %v372_v38 = vld [vmem:[#allocation2 + $0x2] sm:$0xff]  ;;  %v1792_v39 = vpack.c.bf16 %v262_v36, %v262_v36  ;;  %v1793_v40 = vpack.c.bf16 %v263_v37, %v263_v37  ;;  %v373_v41 = vld [vmem:[#allocation2 + $0xa] sm:$0xff] }
  0x1a   : > { %v1810_v42 = vpack.c.bf16 %v372_v38, %v372_v38  ;;  %v264_v43 = vld [vmem:[#allocation2 + $0x10] sm:$0xff]  ;;  %v1811_v45 = vpack.c.bf16 %v373_v41, %v373_v41  ;;  %v2092_v36 = vld [vmem:[%s2469_s2 + $0x8] sm:$0xff]  }
  0x1b   : > { %1857 = vmatpush3.bf16.msra.mxu0 %v2062_v17  ;;  %v319_v44 = vld [vmem:[#allocation2 + $0x11] sm:$0xff]  ;;  %v1794_v47 = vpack.c.bf16 %v264_v43, %v264_v43  ;;  %v320_v48 = vld [vmem:[#allocation2 + $0x19] sm:$0xff]  ;;  %308 = vst [vmem:[#allocation4] sm:$0xf] %v1792_v39  ;;  %309 = vst [vmem:[#allocation4 + $0xc] sm:$0xf] %v1793_v40 }
  0x1c   : > { %1975 = vmatpush3.bf16.msra.mxu1 %v2063_v18  ;;  %1858 = vmatprep.subr.bf16.mxu0 %v2064_v19  ;;  %v265_v46 = vld [vmem:[#allocation2 + $0x18] sm:$0xff]  ;;  %v1803_v49 = vpack.c.bf16 %v319_v44, %v319_v44  ;;  %418 = vst [vmem:[#allocation4 + $0x8] sm:$0xf] %v1810_v42  ;;  %v1804_v52 = vpack.c.bf16 %v320_v48, %v320_v48  ;;  %v266_v55 = vld [vmem:[#allocation2 + $0x20] sm:$0xff]  ;;  %v267_v56 = vld [vmem:[#allocation2 + $0x28] sm:$0xff] }
  0x1d   : > { %1976 = vmatprep.subr.bf16.mxu1 %v2142_v2  ;;  %v374_v50 = vld [vmem:[#allocation2 + $0x12] sm:$0xff]  ;;  %v1795_v51 = vpack.c.bf16 %v265_v46, %v265_v46  ;;  %v375_v53 = vld [vmem:[#allocation2 + $0x1a] sm:$0xff]  ;;  %419 = vst [vmem:[#allocation4 + $0x14] sm:$0xf] %v1811_v45  ;;  %310 = vst [vmem:[#allocation4 + $0x18] sm:$0xf] %v1794_v47  ;;  %v1796_v58 = vpack.c.bf16 %v266_v55, %v266_v55  ;;  %v1797_v59 = vpack.c.bf16 %v267_v56, %v267_v56 }
  0x1e   : > { %v1812_v54 = vpack.c.bf16 %v374_v50, %v374_v50  ;;  %365 = vst [vmem:[#allocation4 + $0x1c] sm:$0xf] %v1803_v49  ;;  %v1813_v57 = vpack.c.bf16 %v375_v53, %v375_v53  ;;  %v321_v60 = vld [vmem:[#allocation2 + $0x21] sm:$0xff]  ;;  %v322_v61 = vld [vmem:[#allocation2 + $0x29] sm:$0xff]  ;;  %366 = vst [vmem:[#allocation4 + $0x28] sm:$0xf] %v1804_v52 }
  0x1f   : > { %1859 = vmatpush3.bf16.msra.mxu0 %v2065_v20  ;;  %v376_v62 = vld [vmem:[#allocation2 + $0x22] sm:$0xff]  ;;  %311 = vst [vmem:[#allocation4 + $0x24] sm:$0xf] %v1795_v51  ;;  %v1805_v63 = vpack.c.bf16 %v321_v60, %v321_v60  ;;  %v1806_v0 = vpack.c.bf16 %v322_v61, %v322_v61  ;;  %v377_v1 = vld [vmem:[#allocation2 + $0x2a] sm:$0xff]  ;;  %v269_v5 = vld [vmem:[#allocation2 + $0x38] sm:$0xff] }
  0x20   : > { %1977 = vmatpush3.bf16.msra.mxu1 %v2066_v21  ;;  %1860 = vmatprep.subr.bf16.mxu0 %v2067_v24  ;;  %420 = vst [vmem:[#allocation4 + $0x20] sm:$0xf] %v1812_v54  ;;  %v1814_v3 = vpack.c.bf16 %v376_v62, %v376_v62  ;;  %v268_v4 = vld [vmem:[#allocation2 + $0x30] sm:$0xff]  ;;  %421 = vst [vmem:[#allocation4 + $0x2c] sm:$0xf] %v1813_v57  ;;  %v1815_v6 = vpack.c.bf16 %v377_v1, %v377_v1  ;;  %v324_v10 = vld [vmem:[#allocation2 + $0x39] sm:$0xff] }
  0x21   : > { %1978 = vmatprep.subr.bf16.mxu1 %v2142_v2  ;;  %312 = vst [vmem:[#allocation4 + $0x30] sm:$0xf] %v1796_v58  ;;  %313 = vst [vmem:[#allocation4 + $0x3c] sm:$0xf] %v1797_v59  ;;  %v1798_v7 = vpack.c.bf16 %v268_v4, %v268_v4  ;;  %v1799_v8 = vpack.c.bf16 %v269_v5, %v269_v5  ;;  %v323_v9 = vld [vmem:[#allocation2 + $0x31] sm:$0xff]  ;;  %v1808_v13 = vpack.c.bf16 %v324_v10, %v324_v10  ;;  %v379_v14 = vld [vmem:[#allocation2 + $0x3a] sm:$0xff] }
  0x22   : > { %v378_v11 = vld [vmem:[#allocation2 + $0x32] sm:$0xff]  ;;  %367 = vst [vmem:[#allocation4 + $0x34] sm:$0xf] %v1805_v63  ;;  %368 = vst [vmem:[#allocation4 + $0x40] sm:$0xf] %v1806_v0  ;;  %v1807_v12 = vpack.c.bf16 %v323_v9, %v323_v9  ;;  %v270_v16 = vld [vmem:[#allocation2 + $0x40] sm:$0xff]  ;;  %v1817_v18 = vpack.c.bf16 %v379_v14, %v379_v14 }
  0x23   : > { %1861 = vmatpush3.bf16.msra.mxu0 %v2068_v28  ;;  %422 = vst [vmem:[#allocation4 + $0x38] sm:$0xf] %v1814_v3  ;;  %v1816_v15 = vpack.c.bf16 %v378_v11, %v378_v11  ;;  %v325_v17 = vld [vmem:[#allocation2 + $0x41] sm:$0xff]  ;;  %423 = vst [vmem:[#allocation4 + $0x44] sm:$0xf] %v1815_v6  ;;  %v1800_v19 = vpack.c.bf16 %v270_v16, %v270_v16  ;;  %v2094_v50 = vld [vmem:[%s2469_s2 + $0x50] sm:$0xff]  }
  0x24   : > { %1979 = vmatpush3.bf16.msra.mxu1 %v2071_v34  ;;  %1905 = vmatprep.subr.bf16.mxu0 %v2089_v35  ;;  %314 = vst [vmem:[#allocation4 + $0x48] sm:$0xf] %v1798_v7  ;;  %315 = vst [vmem:[#allocation4 + $0x54] sm:$0xf] %v1799_v8  ;;  %v1809_v20 = vpack.c.bf16 %v325_v17, %v325_v17  ;;  %v380_v21 = vld [vmem:[#allocation2 + $0x42] sm:$0xff]  ;;  %v2099_v51 = vld [vmem:[%s2469_s2 + $0x90] sm:$0xff]  }
  0x25   : > { %2000 = vmatprep.subr.bf16.mxu1 %v2142_v2  ;;  %v2090_v24 = vld [vmem:[%s2469_s2] sm:$0xff]   ;;  %369 = vst [vmem:[#allocation4 + $0x4c] sm:$0xf] %v1807_v12  ;;  %370 = vst [vmem:[#allocation4 + $0x58] sm:$0xf] %v1808_v13  ;;  %v1818_v25 = vpack.c.bf16 %v380_v21, %v380_v21  ;;  %v2091_v28 = vld [vmem:[%s2469_s2 + $0x48] sm:$0xff]  }
  0x26   : > { %424 = vst [vmem:[#allocation4 + $0x50] sm:$0xf] %v1816_v15  ;;  %v2069_v26 = vld [vmem:[#allocation4 + $0x4] ss:$12 sps:$4 sm:$0xff]   ;;  %425 = vst [vmem:[#allocation4 + $0x5c] sm:$0xf] %v1817_v18 }
  0x27   : > { %316 = vst [vmem:[#allocation4 + $0x60] sm:$0xf] %v1800_v19  ;;  %371 = vst [vmem:[#allocation4 + $0x64] sm:$0xf] %v1809_v20  ;;  %v2072_v33 = vld [vmem:[#allocation4] ss:$12 sps:$4 sm:$0xff]   ;;  %751 = vmatprep.mubr.bf16.mxu0 %v2069_v26 }
  0x28   : > { %426 = vst [vmem:[#allocation4 + $0x68] sm:$0xf] %v1818_v25  ;;  %v2073_v34 = vld [vmem:[#allocation4 + $0x8] ss:$12 sps:$4 sm:$0xff]   ;;  %752 = vmatmul.mubr.bf16.vlgmr.msra.gmra.mrb[0].mxu0 %v2072_v33  ;;  %v2076_v37 = vld [vmem:[#allocation4 + $0x18] ss:$12 sps:$4 sm:$0xff]  }
  0x29   : > { %v2074_v35 = vld [vmem:[#allocation4 + $0x1c] ss:$12 sps:$4 sm:$0xff]   ;;  %1981 = vmatmul.mubr.bf16.vlgmr.msra.gmra.mrb[0].mxu1 %v2073_v34  ;;  %1906 = vmatpush3.bf16.msra.mxu0 %v2090_v24  ;;  %v2077_v38 = vld [vmem:[#allocation4 + $0x20] ss:$12 sps:$4 sm:$0xff]   ;;  %v2095_v52 = vld [vmem:[%s2469_s2 + $0x10] sm:$0xff]  }
  0x2a   : > { %759 = vmatprep.mubr.bf16.mxu0 %v2074_v35  ;;  %1984 = vmatprep.mubr.msk.bf16.mxu1 %vm2143_vm0, %v2142_v2  ;;  %v2078_v39 = vld [vmem:[#allocation4 + $0x34] ss:$12 sps:$4 sm:$0xff]   ;;  %v2080_v40 = vld [vmem:[#allocation4 + $0x30] ss:$12 sps:$4 sm:$0xff]   ;;  %v2081_v41 = vld [vmem:[#allocation4 + $0x38] ss:$12 sps:$4 sm:$0xff]  }
  0x2b   : > { %1907 = vmatprep.subr.bf16.mxu0 %v2091_v28  ;;  %2001 = vmatpush3.bf16.msra.mxu1 %v2093_v32  ;;  %v2084_v44 = vld [vmem:[#allocation4 + $0x48] ss:$12 sps:$4 sm:$0xff]   ;;  %v2097_v53 = vld [vmem:[%s2469_s2 + $0x58] sm:$0xff]   ;;  %v2100_v56 = vld [vmem:[%s2469_s2 + $0x60] sm:$0xff]  }
  0x2c   : > { %2002 = vmatprep.subr.bf16.mxu1 %v2142_v2  ;;  %v2082_v42 = vld [vmem:[#allocation4 + $0x4c] ss:$12 sps:$4 sm:$0xff]   ;;  %v2104_v57 = vld [vmem:[%s2469_s2 + $0xa0] sm:$0xff]   ;;  %v2107_v62 = vld [vmem:[%s2469_s2 + $0x70] sm:$0xff]  }
  0x2d   : > { %1908 = vmatpush3.bf16.msra.mxu0 %v2092_v36  ;;  %v2085_v45 = vld [vmem:[#allocation4 + $0x50] ss:$12 sps:$4 sm:$0xff]   ;;  %v2096_v49 = vld [vmem:[%s2469_s2 + $0x88] sm:$0xff]   ;;  %v2101_v58 = vld [vmem:[%s2469_s2 + $0x20] sm:$0xff]  }
  0x2e   : > { %v443_v43 = vld [vmem:[#allocation4 + $0x60] sm:$0xff]  ;;  %1909 = vmatprep.subr.bf16.mxu0 %v2094_v50  ;;  %v2102_v54 = vld [vmem:[%s2469_s2 + $0x98] sm:$0xff]   ;;  %v2103_v59 = vld [vmem:[%s2469_s2 + $0x68] sm:$0xff]  }
  0x2f   : > { %v1680_v46 = vcombine.high %v443_v43, %v443_v43  ;;  %v1679_v47 = vcombine.low %v443_v43, %v443_v43  ;;  %v2088_v48 = vld [vmem:[#allocation4 + $0x68] ss:$0 sps:$4 sm:$0xff]   ;;  %2003 = vmatpush3.bf16.msra.mxu1 %v2096_v49  ;;  %v2098_v55 = vld [vmem:[%s2469_s2 + $0x18] sm:$0xff]   ;;  %v2109_v63 = vld [vmem:[%s2469_s2 + $0xb0] sm:$0xff]  }
  0x30   : > { %760 = vmatmul.mubr.bf16.gmra.mrb[4].mxu0 %v2076_v37  ;;  %2004 = vmatprep.subr.bf16.mxu1 %v2142_v2  ;;  %v2106_v60 = vld [vmem:[%s2469_s2 + $0xa8] sm:$0xff]   ;;  %v2108_v0 = vld [vmem:[%s2469_s2 + $0x30] sm:$0xff]   ;;  %v2110_v1 = vld [vmem:[%s2469_s2 + $0x78] sm:$0xff]  }
  0x31   : > { %1985 = vmatmul.mubr.bf16.gmra.mrb[4].mxu1 %v2077_v38  ;;  %767 = vmatprep.mubr.bf16.mxu0 %v2078_v39  ;;  %v2105_v61 = vld [vmem:[%s2469_s2 + $0x28] sm:$0xff]   ;;  %v2112_v3 = vld [vmem:[%s2469_s2 + $0xb8] sm:$0xff]   ;;  %v2407_v7 = vld [vmem:[%s2470_s3] ss:$0 sm:$0xff] }
  0x32   : > { %1988 = vmatprep.mubr.msk.bf16.mxu1 %vm2143_vm0, %v2142_v2  ;;  %1910 = vmatpush3.bf16.msra.mxu0 %v2095_v52  ;;  %v2111_v4 = vld [vmem:[%s2469_s2 + $0x38] sm:$0xff]  }
  0x33   : > { %2005 = vmatpush3.bf16.msra.mxu1 %v2099_v51  ;;  %1911 = vmatprep.subr.bf16.mxu0 %v2097_v53 }
  0x34   : > { %2006 = vmatprep.subr.bf16.mxu1 %v2142_v2 }
  0x36   : > { %1912 = vmatpush3.bf16.msra.mxu0 %v2098_v55 }
  0x37   : > { %2007 = vmatpush3.bf16.msra.mxu1 %v2102_v54  ;;  %1913 = vmatprep.subr.bf16.mxu0 %v2100_v56 }
  0x38   : > { %768 = vmatmul.mubr.bf16.gmra.mrb[8].mxu0 %v2080_v40  ;;  %2008 = vmatprep.subr.bf16.mxu1 %v2142_v2 }
  0x39   : > { %1989 = vmatmul.mubr.bf16.gmra.mrb[8].mxu1 %v2081_v41  ;;  %775 = vmatprep.mubr.bf16.mxu0 %v2082_v42 }
  0x3a   : > { %1992 = vmatprep.mubr.msk.bf16.mxu1 %vm2143_vm0, %v2142_v2  ;;  %1914 = vmatpush3.bf16.msra.mxu0 %v2101_v58 }
  0x3b   : > { %2009 = vmatpush3.bf16.msra.mxu1 %v2104_v57  ;;  %1915 = vmatprep.subr.bf16.mxu0 %v2103_v59 }
  0x3c   : > { %2010 = vmatprep.subr.bf16.mxu1 %v2142_v2 }
  0x3e   : > { %1916 = vmatpush3.bf16.msra.mxu0 %v2105_v61 }
  0x3f   : > { %2011 = vmatpush3.bf16.msra.mxu1 %v2106_v60  ;;  %1917 = vmatprep.subr.bf16.mxu0 %v2107_v62 }
  0x40   : > { %776 = vmatmul.mubr.bf16.gmra.mrb[12].mxu0 %v2084_v44  ;;  %2012 = vmatprep.subr.bf16.mxu1 %v2142_v2 }
  0x41   : > { %1993 = vmatmul.mubr.bf16.gmra.mrb[12].mxu1 %v2085_v45  ;;  %783 = vmatprep.mubr.bf16.mxu0 %v1680_v46 }
  0x42   : > { %1996 = vmatprep.mubr.msk.bf16.mxu1 %vm2143_vm0, %v2142_v2  ;;  %1918 = vmatpush3.bf16.msra.mxu0 %v2108_v0 }
  0x43   : > { %2013 = vmatpush3.bf16.msra.mxu1 %v2109_v63  ;;  %1919 = vmatprep.subr.bf16.mxu0 %v2110_v1 }
  0x44   : > { %2014 = vmatprep.subr.bf16.mxu1 %v2142_v2 }
  0x46   : > { %1920 = vmatpush3.bf16.msra.mxu0 %v2111_v4 }
  0x47   : > { %2015 = vmatpush3.bf16.msra.mxu1 %v2112_v3 }
  0x48   : > { %784 = vmatmul.mubr.bf16.gmra.mrb[16].mxu0 %v1679_v47 }
  0x49   : > { %1997 = vmatmul.mubr.bf16.gmra.mrb[16].mxu1 %v2088_v48 }
  0x4a   : > { %2016 = vmatprep.mubr.msk.bf16.mxu1 %vm2143_vm0, %v2142_v2 }
  0xfb   : > { %v1862_v5 = vpop.f32.mrb[0].mxu0 }
  0xfc   : > { %v1863_v6 = vpop.f32.mrb[1].mxu0  ;;  %v825_v8 = vpop.f32.mrb[0].mxu1 }
  0xfd   : > { %v1864_v9 = vadd.f32 %v1863_v6, %v1862_v5  ;;  %v1865_v10 = vpop.f32.mrb[2].mxu0  ;;  %v1982_v11 = vpop.f32.mrb[1].mxu1 }
  0xfe   : > { %v1866_v12 = vpop.f32.mrb[3].mxu0  ;;  %v828_v13 = vpop.f32.mrb[2].mxu1 }
  0xff   : > { %v754_v14 = vadd.f32 %v1864_v9, %v2407_v7  ;;  %v1867_v15 = vadd.f32 %v1866_v12, %v1865_v10  ;;  %v1983_v16 = vpop.f32.mrb[3].mxu1 }
 0x101   : > { %v826_v17 = vadd.f32 %v825_v8, %v754_v14  ;;  %v757_v18 = vadd.f32 %v1867_v15, %v2407_v7 }
 0x103   : > { %v863_v19 = vmax.f32 %v826_v17, 0.0  ;;  %v829_v20 = vadd.f32 %v828_v13, %v757_v18  ;;  %v1868_v21 = vpop.f32.mrb[4].mxu0 }
 0x104   : > { %v1869_v24 = vpop.f32.mrb[5].mxu0  ;;  %v833_v25 = vpop.f32.mrb[4].mxu1 }
 0x105   : > { %873 = vst [vmem:[#allocation3 + $0x1] sm:$0xff] %v863_v19  ;;  %v1828_v26 = vpack.c.bf16 %v863_v19, %v863_v19  ;;  %v864_v28 = vmax.f32 %v829_v20, 0.0  ;;  %v1870_v32 = vadd.f32 %v1869_v24, %v1868_v21  ;;  %v1871_v33 = vpop.f32.mrb[6].mxu0  ;;  %v1986_v34 = vpop.f32.mrb[5].mxu1 }
 0x106   : > { %v1872_v35 = vpop.f32.mrb[7].mxu0  ;;  %v836_v36 = vpop.f32.mrb[6].mxu1 }
 0x107   : > { %993 = vst [vmem:[#allocation4 + $0x4] sm:$0xf] %v1828_v26  ;;  %874 = vst [vmem:[#allocation3 + $0x9] sm:$0xff] %v864_v28  ;;  %v1829_v37 = vpack.c.bf16 %v864_v28, %v864_v28  ;;  %v762_v38 = vadd.f32 %v1870_v32, %v2407_v7  ;;  %v1873_v39 = vadd.f32 %v1872_v35, %v1871_v33  ;;  %v1987_v40 = vpop.f32.mrb[7].mxu1 }
 0x109   : > { %994 = vst [vmem:[#allocation4 + $0x10] sm:$0xf] %v1829_v37  ;;  %v834_v41 = vadd.f32 %v833_v25, %v762_v38  ;;  %v765_v42 = vadd.f32 %v1873_v39, %v2407_v7 }
 0x10b   : > { %v865_v43 = vmax.f32 %v834_v41, 0.0  ;;  %v837_v44 = vadd.f32 %v836_v36, %v765_v42  ;;  %v1874_v45 = vpop.f32.mrb[8].mxu0 }
 0x10c   : > { %v892_v46 = vld [vmem:[#allocation3] sm:$0xff]  ;;  %v1875_v47 = vpop.f32.mrb[9].mxu0  ;;  %v841_v48 = vpop.f32.mrb[8].mxu1 }
 0x10d   : > { %v1819_v49 = vpack.c.bf16 %v892_v46, %v892_v46  ;;  %877 = vst [vmem:[#allocation3 + $0x11] sm:$0xfc] %v865_v43  ;;  %v866_v50 = vmax.f32 %v837_v44, 0.0  ;;  %v1876_v51 = vadd.f32 %v1875_v47, %v1874_v45  ;;  %v1877_v52 = vpop.f32.mrb[10].mxu0  ;;  %v1990_v53 = vpop.f32.mrb[9].mxu1 }
 0x10e   : > { %v893_v54 = vld [vmem:[#allocation3 + $0x8] sm:$0xff]  ;;  %v1878_v57 = vpop.f32.mrb[11].mxu0  ;;  %v844_v58 = vpop.f32.mrb[10].mxu1 }
 0x10f   : > { %v1002_v55 = vld [vmem:[#allocation3 + $0x2] sm:$0xff]  ;;  %v1003_v56 = vld [vmem:[#allocation3 + $0xa] sm:$0xff]  ;;  %938 = vst [vmem:[#allocation4] sm:$0xf] %v1819_v49  ;;  %v1820_v59 = vpack.c.bf16 %v893_v54, %v893_v54  ;;  %878 = vst [vmem:[#allocation3 + $0x19] sm:$0xff] %v866_v50  ;;  %v1831_v62 = vpack.c.bf16 %v866_v50, %v866_v50  ;;  %v1991_v63 = vpop.f32.mrb[11].mxu1  ;;  %v770_v0 = vadd.f32 %v1876_v51, %v2407_v7 }
 0x110   : > { %v1837_v60 = vpack.c.bf16 %v1002_v55, %v1002_v55  ;;  %v1838_v61 = vpack.c.bf16 %v1003_v56, %v1003_v56  ;;  %v1879_v1 = vadd.f32 %v1878_v57, %v1877_v52  ;;  %v2115_v36 = vld [vmem:[#allocation4 + $0x4] ss:$12 sps:$4 sm:$0xff]  }
 0x111   : > { %939 = vst [vmem:[#allocation4 + $0xc] sm:$0xf] %v1820_v59  ;;  %996 = vst [vmem:[#allocation4 + $0x28] sm:$0xf] %v1831_v62  ;;  %v842_v3 = vadd.f32 %v841_v48, %v770_v0  ;;  %1381 = vmatprep.mubr.bf16.mxu0 %v2115_v36 }
 0x112   : > { %1048 = vst [vmem:[#allocation4 + $0x8] sm:$0xf] %v1837_v60  ;;  %1049 = vst [vmem:[#allocation4 + $0x14] sm:$0xf] %v1838_v61  ;;  %v773_v4 = vadd.f32 %v1879_v1, %v2407_v7 }
 0x113   : > { %v1880_v5 = vpop.f32.mrb[12].mxu0  ;;  %v867_v9 = vmax.f32 %v842_v3, 0.0 }
 0x114   : > { %v894_v6 = vld [vmem:[#allocation3 + $0x10] sm:$0xff]  ;;  %v845_v10 = vadd.f32 %v844_v58, %v773_v4  ;;  %v1881_v11 = vpop.f32.mrb[13].mxu0  ;;  %v849_v12 = vpop.f32.mrb[12].mxu1 }
 0x115   : > { %v949_v8 = vld [vmem:[#allocation3 + $0x11] sm:$0xff]  ;;  %v1821_v13 = vpack.c.bf16 %v894_v6, %v894_v6  ;;  %v1882_v15 = vadd.f32 %v1881_v11, %v1880_v5  ;;  %v1883_v16 = vpop.f32.mrb[14].mxu0  ;;  %v1994_v17 = vpop.f32.mrb[13].mxu1  ;;  %879 = vst [vmem:[#allocation3 + $0x21] sm:$0xf3] %v867_v9  }
 0x116   : > { %v1830_v14 = vpack.c.bf16 %v949_v8, %v949_v8  ;;  %v895_v18 = vld [vmem:[#allocation3 + $0x18] sm:$0xff]  ;;  %v868_v20 = vmax.f32 %v845_v10, 0.0  ;;  %v1884_v21 = vpop.f32.mrb[15].mxu0  ;;  %v852_v24 = vpop.f32.mrb[14].mxu1 }
 0x117   : > { %v1004_v19 = vld [vmem:[#allocation3 + $0x12] sm:$0xff]  ;;  %940 = vst [vmem:[#allocation4 + $0x18] sm:$0xf] %v1821_v13  ;;  %v1822_v25 = vpack.c.bf16 %v895_v18, %v895_v18  ;;  %v778_v28 = vadd.f32 %v1882_v15, %v2407_v7  ;;  %v1885_v32 = vadd.f32 %v1884_v21, %v1883_v16  ;;  %v1995_v33 = vpop.f32.mrb[15].mxu1 }
 0x118   : > { %995 = vst [vmem:[#allocation4 + $0x1c] sm:$0xf] %v1830_v14  ;;  %v1839_v26 = vpack.c.bf16 %v1004_v19, %v1004_v19  ;;  %883 = vst [vmem:[#allocation3 + $0x29] sm:$0xff] %v868_v20  ;;  %v1833_v34 = vpack.c.bf16 %v868_v20, %v868_v20  ;;  %v2113_v35 = vld [vmem:[#allocation4] ss:$12 sps:$4 sm:$0xff]  }
 0x119   : > { %941 = vst [vmem:[#allocation4 + $0x24] sm:$0xf] %v1822_v25  ;;  %v850_v37 = vadd.f32 %v849_v12, %v778_v28  ;;  %v781_v38 = vadd.f32 %v1885_v32, %v2407_v7  ;;  %v2116_v39 = vld [vmem:[#allocation4 + $0x8] ss:$12 sps:$4 sm:$0xff]   ;;  %1382 = vmatmul.mubr.bf16.vlgmr.msra.gmra.mrb[20].mxu0 %v2113_v35 }
 0x11a   : > { %1050 = vst [vmem:[#allocation4 + $0x20] sm:$0xf] %v1839_v26  ;;  %998 = vst [vmem:[#allocation4 + $0x40] sm:$0xf] %v1833_v34  ;;  %2017 = vmatmul.mubr.bf16.vlgmr.msra.gmra.mrb[20].mxu1 %v2116_v39 }
 0x11b   : > { %v869_v40 = vmax.f32 %v850_v37, 0.0  ;;  %v853_v41 = vadd.f32 %v852_v24, %v781_v38  ;;  %v1886_v42 = vpop.f32.mrb[16].mxu0  ;;  %2020 = vmatprep.mubr.msk.bf16.mxu1 %vm2143_vm0, %v2142_v2 }
 0x11c   : > { %v1887_v43 = vpop.f32.mrb[17].mxu0  ;;  %v857_v44 = vpop.f32.mrb[16].mxu1  ;;  %v896_v45 = vld [vmem:[#allocation3 + $0x20] sm:$0xff] }
 0x11d   : > { %v951_v46 = vld [vmem:[#allocation3 + $0x21] sm:$0xff]  ;;  %884 = vst [vmem:[#allocation3 + $0x31] sm:$0xcf] %v869_v40   ;;  %v870_v48 = vmax.f32 %v853_v41, 0.0  ;;  %v1888_v49 = vadd.f32 %v1887_v43, %v1886_v42  ;;  %v1889_v50 = vpop.f32.mrb[18].mxu0  ;;  %v1998_v51 = vpop.f32.mrb[17].mxu1  ;;  %v1823_v52 = vpack.c.bf16 %v896_v45, %v896_v45 }
 0x11e   : > { %v1005_v47 = vld [vmem:[#allocation3 + $0x1a] sm:$0xff]  ;;  %v1832_v53 = vpack.c.bf16 %v951_v46, %v951_v46  ;;  %v1890_v55 = vpop.f32.mrb[19].mxu0  ;;  %v860_v56 = vpop.f32.mrb[18].mxu1  ;;  %v2429_v43 = vld [vmem:[%s2471_s4] ss:$0 sm:$0xff] }
 0x11f   : > { %v1840_v54 = vpack.c.bf16 %v1005_v47, %v1005_v47  ;;  %v897_v57 = vld [vmem:[#allocation3 + $0x28] sm:$0xff]  ;;  %888 = vst [vmem:[#allocation3 + $0x39] sm:$0xff] %v870_v48  ;;  %v1835_v59 = vpack.c.bf16 %v870_v48, %v870_v48  ;;  %v786_v60 = vadd.f32 %v1888_v49, %v2407_v7  ;;  %v1999_v61 = vpop.f32.mrb[19].mxu1  ;;  %942 = vst [vmem:[#allocation4 + $0x30] sm:$0xf] %v1823_v52 }
 0x120   : > { %v1006_v58 = vld [vmem:[#allocation3 + $0x22] sm:$0xff]  ;;  %997 = vst [vmem:[#allocation4 + $0x34] sm:$0xf] %v1832_v53  ;;  %v1824_v62 = vpack.c.bf16 %v897_v57, %v897_v57  ;;  %v2117_v0 = vld [vmem:[#allocation4 + $0x1c] ss:$12 sps:$4 sm:$0xff]  }
 0x121   : > { %1051 = vst [vmem:[#allocation4 + $0x2c] sm:$0xf] %v1840_v54  ;;  %v1841_v63 = vpack.c.bf16 %v1006_v58, %v1006_v58  ;;  %v2119_v1 = vld [vmem:[#allocation4 + $0x18] ss:$12 sps:$4 sm:$0xff]   ;;  %1000 = vst [vmem:[#allocation4 + $0x58] sm:$0xf] %v1835_v59  ;;  %v858_v3 = vadd.f32 %v857_v44, %v786_v60  ;;  %1389 = vmatprep.mubr.bf16.mxu0 %v2117_v0 }
 0x122   : > { %943 = vst [vmem:[#allocation4 + $0x3c] sm:$0xf] %v1824_v62  ;;  %1390 = vmatmul.mubr.bf16.gmra.mrb[24].mxu0 %v2119_v1  ;;  %v1506_v62 = vrot.slane %v2294_v27, 6  ;;  %v1507_v1 = vrot.slane %v2300_v29, 6 }
 0x123   : > { %1052 = vst [vmem:[#allocation4 + $0x38] sm:$0xf] %v1841_v63  ;;  %v871_v4 = vmax.f32 %v858_v3, 0.0 }
 0x124   : > { %v898_v5 = vld [vmem:[#allocation3 + $0x30] sm:$0xff] }
 0x125   : > { %v953_v6 = vld [vmem:[#allocation3 + $0x31] sm:$0xff]  ;;  %v1825_v9 = vpack.c.bf16 %v898_v5, %v898_v5  ;;  %889 = vst [vmem:[#allocation3 + $0x41] sm:$0x3f] %v871_v4 }
 0x126   : > { %v1007_v8 = vld [vmem:[#allocation3 + $0x2a] sm:$0xff]  ;;  %v1834_v7 = vpack.c.bf16 %v953_v6, %v953_v6  ;;  %v899_v11 = vld [vmem:[#allocation3 + $0x38] sm:$0xff] }
 0x127   : > { %v1842_v10 = vpack.c.bf16 %v1007_v8, %v1007_v8  ;;  %v1008_v12 = vld [vmem:[#allocation3 + $0x32] sm:$0xff]  ;;  %944 = vst [vmem:[#allocation4 + $0x48] sm:$0xf] %v1825_v9  ;;  %v1826_v13 = vpack.c.bf16 %v899_v11, %v899_v11  ;;  %v1508_v8 = vsel %vm1505_vm1, %v1506_v62, %v1507_v1 }
 0x128   : > { %999 = vst [vmem:[#allocation4 + $0x4c] sm:$0xf] %v1834_v7  ;;  %v1843_v14 = vpack.c.bf16 %v1008_v12, %v1008_v12  ;;  %v2120_v15 = vld [vmem:[#allocation4 + $0x20] ss:$12 sps:$4 sm:$0xff]  }
 0x129   : > { %1053 = vst [vmem:[#allocation4 + $0x44] sm:$0xf] %v1842_v10  ;;  %945 = vst [vmem:[#allocation4 + $0x54] sm:$0xf] %v1826_v13  ;;  %2021 = vmatmul.mubr.bf16.gmra.mrb[24].mxu1 %v2120_v15  ;;  %v2121_v16 = vld [vmem:[#allocation4 + $0x34] ss:$12 sps:$4 sm:$0xff]  }
 0x12a   : > { %1054 = vst [vmem:[#allocation4 + $0x50] sm:$0xf] %v1843_v14  ;;  %v2123_v17 = vld [vmem:[#allocation4 + $0x30] ss:$12 sps:$4 sm:$0xff]   ;;  %2024 = vmatprep.mubr.msk.bf16.mxu1 %vm2143_vm0, %v2142_v2  ;;  %1397 = vmatprep.mubr.bf16.mxu0 %v2121_v16  ;;  %v1527_v16 = vrot.slane %v2303_v30, 4 }
 0x12b   : > { %1398 = vmatmul.mubr.bf16.gmra.mrb[28].mxu0 %v2123_v17  ;;  %v1528_v17 = vrot.slane %v2305_v31, 4 }
 0x12c   : > { %v900_v18 = vld [vmem:[#allocation3 + $0x40] sm:$0xff] }
 0x12d   : > { %v955_v19 = vld [vmem:[#allocation3 + $0x41] sm:$0xff]  ;;  %v1827_v21 = vpack.c.bf16 %v900_v18, %v900_v18 }
 0x12e   : > { %v1009_v20 = vld [vmem:[#allocation3 + $0x3a] sm:$0xff]  ;;  %v1836_v24 = vpack.c.bf16 %v955_v19, %v955_v19  ;;  %v1010_v25 = vld [vmem:[#allocation3 + $0x42] sm:$0xff] }
 0x12f   : > { %v1844_v26 = vpack.c.bf16 %v1009_v20, %v1009_v20  ;;  %v1845_v28 = vpack.c.bf16 %v1010_v25, %v1010_v25  ;;  %946 = vst [vmem:[#allocation4 + $0x60] sm:$0xf] %v1827_v21  ;;  %v2125_v33 = vld [vmem:[#allocation4 + $0x4c] ss:$12 sps:$4 sm:$0xff]  }
 0x130   : > { %v2124_v32 = vld [vmem:[#allocation4 + $0x38] ss:$12 sps:$4 sm:$0xff]   ;;  %1001 = vst [vmem:[#allocation4 + $0x64] sm:$0xf] %v1836_v24  ;;  %v2127_v34 = vld [vmem:[#allocation4 + $0x48] ss:$12 sps:$4 sm:$0xff]   ;;  %1405 = vmatprep.mubr.bf16.mxu0 %v2125_v33 }
 0x131   : > { %1055 = vst [vmem:[#allocation4 + $0x5c] sm:$0xf] %v1844_v26  ;;  %1056 = vst [vmem:[#allocation4 + $0x68] sm:$0xf] %v1845_v28  ;;  %2025 = vmatmul.mubr.bf16.gmra.mrb[28].mxu1 %v2124_v32  ;;  %v1529_v32 = vsel %vm1526_vm2, %v1527_v16, %v1528_v17 }
 0x132   : > { %2028 = vmatprep.mubr.msk.bf16.mxu1 %vm2143_vm0, %v2142_v2 }
 0x133   : > { %1406 = vmatmul.mubr.bf16.gmra.mrb[32].mxu0 %v2127_v34 }
 0x137   : > { %v1073_v35 = vld [vmem:[#allocation4 + $0x60] sm:$0xff] }
 0x138   : > { %v2129_v36 = vld [vmem:[#allocation4 + $0x50] ss:$12 sps:$4 sm:$0xff]   ;;  %v1747_v37 = vcombine.high %v1073_v35, %v1073_v35  ;;  %v1746_v38 = vcombine.low %v1073_v35, %v1073_v35  ;;  %v2131_v39 = vld [vmem:[#allocation4 + $0x68] ss:$0 sps:$4 sm:$0xff]  }
 0x139   : > { %2029 = vmatmul.mubr.bf16.gmra.mrb[32].mxu1 %v2129_v36 }
 0x13a   : > { %1413 = vmatprep.mubr.bf16.mxu0 %v1747_v37  ;;  %2032 = vmatprep.mubr.msk.bf16.mxu1 %vm2143_vm0, %v2142_v2 }
 0x13b   : > { %1414 = vmatmul.mubr.bf16.gmra.mrb[36].mxu0 %v1746_v38 }
 0x141   : > { %2033 = vmatmul.mubr.bf16.gmra.mrb[36].mxu1 %v2131_v39 }
 0x1ec   : > { %v1921_v41 = vpop.f32.mrb[20].mxu0 }
 0x1ed   : > { %v1455_v40 = vpop.f32.mrb[20].mxu1  ;;  %v1922_v44 = vpop.f32.mrb[21].mxu0 }
 0x1ee   : > { %v2018_v42 = vpop.f32.mrb[21].mxu1  ;;  %v1923_v45 = vadd.f32 %v1922_v44, %v1921_v41  ;;  %v1924_v47 = vpop.f32.mrb[22].mxu0  ;;  %v2132_v44 = vld [vmem:[#allocation2 + $0x37] sm:$0xff] }
 0x1ef   : > { %v1458_v46 = vpop.f32.mrb[22].mxu1  ;;  %v1925_v49 = vpop.f32.mrb[23].mxu0 }
 0x1f0   : > { %v2019_v48 = vpop.f32.mrb[23].mxu1  ;;  %v1384_v2 = vadd.f32 %v1923_v45, %v2429_v43  ;;  %v1926_v50 = vadd.f32 %v1925_v49, %v1924_v47  ;;  %v1548_v45 = vrot.slane %v2132_v44, 2 }
 0x1f2   : > { %v1456_v51 = vadd.f32 %v1455_v40, %v1384_v2  ;;  %v1387_v52 = vadd.f32 %v1926_v50, %v2429_v43 }
 0x1f4   : > { %v1495_v53 = vadd.f32 %v1456_v51, %v2281_v22  ;;  %v1459_v54 = vadd.f32 %v1458_v46, %v1387_v52  ;;  %v2133_v46 = vld [vmem:[#allocation2 + $0x3f] sm:$0xff] }
 0x1f5   : > { %v1927_v55 = vpop.f32.mrb[24].mxu0  ;;  %v1549_v47 = vrot.slane %v2133_v46, 2 }
 0x1f6   : > { %v1928_v56 = vpop.f32.mrb[25].mxu0  ;;  %v1497_v57 = vmax.f32 %v1495_v53, 0.0  ;;  %v1496_v58 = vadd.f32 %v1459_v54, %v2283_v23 }
 0x1f7   : > { %v1929_v59 = vadd.f32 %v1928_v56, %v1927_v55  ;;  %v1930_v60 = vpop.f32.mrb[26].mxu0  ;;  %v1550_v55 = vsel %vm1547_vm3, %v1548_v45, %v1549_v47 }
 0x1f8   : > { %v1931_v61 = vpop.f32.mrb[27].mxu0  ;;  %1499 = vst [vmem:[%s2439_s13] sm:$0xff] %v1497_v57  ;;  %v1498_v22 = vmax.f32 %v1496_v58, 0.0 }
 0x1f9   : > { %v1932_v63 = vadd.f32 %v1931_v61, %v1930_v60  ;;  %v1392_v0 = vadd.f32 %v1929_v59, %v2429_v43 }
 0x1fa   : > { %1500 = vst [vmem:[%s2439_s13 + $0x8] sm:$0xff] %v1498_v22 }
 0x1fb   : > { %v1395_v4 = vadd.f32 %v1932_v63, %v2429_v43 }
 0x1fc   : > { %v1463_v3 = vpop.f32.mrb[24].mxu1 }
 0x1fd   : > { %v1464_v5 = vadd.f32 %v1463_v3, %v1392_v0  ;;  %v2022_v23 = vpop.f32.mrb[25].mxu1 }
 0x1fe   : > { %v1466_v6 = vpop.f32.mrb[26].mxu1  ;;  %v1933_v27 = vpop.f32.mrb[28].mxu0 }
 0x1ff   : > { %v1512_v9 = vadd.f32 %v1506_v62, %v1464_v5  ;;  %v1467_v7 = vadd.f32 %v1466_v6, %v1395_v4  ;;  %v2023_v10 = vpop.f32.mrb[27].mxu1  ;;  %v1934_v11 = vpop.f32.mrb[29].mxu0 }
 0x200   : > { %v1935_v14 = vadd.f32 %v1934_v11, %v1933_v27  ;;  %v1936_v29 = vpop.f32.mrb[30].mxu0 }
 0x201   : > { %v1515_v12 = vmax.f32 %v1512_v9, 0.0  ;;  %v1513_v13 = vadd.f32 %v1508_v8, %v1467_v7  ;;  %v1937_v15 = vpop.f32.mrb[31].mxu0 }
 0x202   : > { %v1938_v19 = vadd.f32 %v1937_v15, %v1936_v29  ;;  %v1400_v20 = vadd.f32 %v1935_v14, %v2429_v43 }
 0x203   : > { %1775 = vst [vmem:[%s2439_s13 + $0xe] sm:$0xfc] %v1515_v12  ;;  %v1516_v18 = vmax.f32 %v1513_v13, 0.0 }
 0x204   : > { %v1471_v21 = vpop.f32.mrb[28].mxu1  ;;  %v1403_v26 = vadd.f32 %v1938_v19, %v2429_v43 }
 0x205   : > { %1776 = vst [vmem:[%s2439_s13 + $0x16] sm:$0xff] %v1516_v18  ;;  %v1472_v24 = vadd.f32 %v1471_v21, %v1400_v20  ;;  %v2026_v25 = vpop.f32.mrb[29].mxu1 }
 0x206   : > { %v1474_v28 = vpop.f32.mrb[30].mxu1  ;;  %v1939_v31 = vpop.f32.mrb[32].mxu0 }
 0x207   : > { %v1514_v33 = vadd.f32 %v1507_v1, %v1472_v24  ;;  %v1533_v34 = vadd.f32 %v1527_v16, %v1472_v24  ;;  %v1475_v30 = vadd.f32 %v1474_v28, %v1403_v26  ;;  %v2027_v35 = vpop.f32.mrb[31].mxu1  ;;  %v1940_v36 = vpop.f32.mrb[33].mxu0 }
 0x208   : > { %v1941_v40 = vadd.f32 %v1940_v36, %v1939_v31  ;;  %v1942_v41 = vpop.f32.mrb[34].mxu0 }
 0x209   : > { %v1517_v37 = vmax.f32 %v1514_v33, 0.0  ;;  %v1536_v38 = vmax.f32 %v1533_v34, 0.0  ;;  %v1534_v39 = vadd.f32 %v1529_v32, %v1475_v30  ;;  %v1943_v42 = vpop.f32.mrb[35].mxu0 }
 0x20a   : > { %v1944_v49 = vadd.f32 %v1943_v42, %v1942_v41  ;;  %v1408_v2 = vadd.f32 %v1941_v40, %v2429_v43 }
 0x20b   : > { %1777 = vst [vmem:[%s2439_s13 + $0x1e] sm:$0x3] %v1517_v37  ;;  %1780 = vst [vmem:[%s2439_s13 + $0x1c] sm:$0xf0] %v1536_v38  ;;  %v1537_v48 = vmax.f32 %v1534_v39, 0.0 }
 0x20c   : > { %v1479_v50 = vpop.f32.mrb[32].mxu1  ;;  %v1411_v53 = vadd.f32 %v1944_v49, %v2429_v43 }
 0x20d   : > { %1781 = vst [vmem:[%s2439_s13 + $0x24] sm:$0xff] %v1537_v48  ;;  %v1480_v51 = vadd.f32 %v1479_v50, %v1408_v2  ;;  %v2030_v52 = vpop.f32.mrb[33].mxu1 }
 0x20e   : > { %v1482_v54 = vpop.f32.mrb[34].mxu1  ;;  %v1945_v59 = vpop.f32.mrb[36].mxu0 }
 0x20f   : > { %v1535_v56 = vadd.f32 %v1528_v17, %v1480_v51  ;;  %v1554_v57 = vadd.f32 %v1548_v45, %v1480_v51  ;;  %v1483_v58 = vadd.f32 %v1482_v54, %v1411_v53  ;;  %v2031_v60 = vpop.f32.mrb[35].mxu1  ;;  %v1946_v61 = vpop.f32.mrb[37].mxu0 }
 0x210   : > { %v1947_v0 = vadd.f32 %v1946_v61, %v1945_v59  ;;  %v1948_v1 = vpop.f32.mrb[38].mxu0 }
 0x211   : > { %v1538_v62 = vmax.f32 %v1535_v56, 0.0  ;;  %v1557_v22 = vmax.f32 %v1554_v57, 0.0  ;;  %v1555_v63 = vadd.f32 %v1550_v55, %v1483_v58  ;;  %v1949_v3 = vpop.f32.mrb[39].mxu0 }
 0x212   : > { %v1416_v5 = vadd.f32 %v1947_v0, %v2429_v43 }
 0x213   : > { %1782 = vst [vmem:[%s2439_s13 + $0x2c] sm:$0xf] %v1538_v62  ;;  %1785 = vst [vmem:[%s2439_s13 + $0x2a] sm:$0xc0] %v1557_v22  ;;  %v1558_v4 = vmax.f32 %v1555_v63, 0.0 }
 0x214   : > { %v1487_v23 = vpop.f32.mrb[36].mxu1 }
 0x215   : > { %1786 = vst [vmem:[%s2439_s13 + $0x32] sm:$0xff] %v1558_v4  ;;  %v1488_v6 = vadd.f32 %v1487_v23, %v1416_v5  ;;  %v2034_v8 = vpop.f32.mrb[37].mxu1 }
 0x216   : > { %v1490_v9 = vpop.f32.mrb[38].mxu1 }
 0x217   : > { %v1556_v7 = vadd.f32 %v1549_v47, %v1488_v6  ;;  %v2035_v27 = vpop.f32.mrb[39].mxu1 }
 0x219   : > { %v1559_v10 = vmax.f32 %v1556_v7, 0.0 }
 0x21b   : > { %1787 = vst [vmem:[%s2439_s13 + $0x3a] sm:$0x3f] %v1559_v10 }
 0x21c PF: > { %s15_s18 = sadd.s32 1, %s2140_s18  }
 0x21d   : > { %p12_p4 = scmp.ge.s32.totalorder %s15_s18, 4  }
 0x21f   :  { %14 = sbr.rel (!%p12_p4) target bundleno = 1 (0x1), region = 76 }

</bundles_post_ra>
